<compile_context>
chip_gen: v6e
topology: v6e:2x2x1
jax: 0.10.0
libtpu: 0.0.40
codegen_flags: <defaults>
</compile_context>

<pallas_src>
import functools
import math

import jax
import jax.numpy as jnp
from jax.experimental import pallas as pl
from jax.experimental.pallas import tpu as pltpu


def _round_up(x: int, m: int) -> int:
    return ((x + m - 1) // m) * m


def _rdagnn_kernel(a_ref, x_ref, drow_ref, dcon_ref, s_ref, o_ref,
                   h_buf, acc_ref, *, n_pad: int, tm: int, tk: int):
    """One grid step of the k-hop propagation.

    a_ref:    (tm, tk)      bf16  raw 0/1 adjacency tile A[rows_i, cols_j] (streamed)
    x_ref:    (n_pad, D)    f32   input features (resident)
    drow_ref: (tm, 1)       f32   d^-1/2 for the output-row tile
    dcon_ref: (tk, 1)       f32   d^-1/2 for the contraction tile
    s_ref:    (1, D)        f32   gate weight w_s
    o_ref:    (n_pad, D)    f32   resident gated accumulator (kernel output)
    h_buf:    (2*n_pad, D)  f32   scratch: ping-pong storage for H_hop / H_{hop+1}
    acc_ref:  (tm, D)       f32   scratch: per-row-tile matmul accumulator
    """
    hop = pl.program_id(0)
    i = pl.program_id(1)
    j = pl.program_id(2)
    nj = pl.num_programs(2)

    src_off = (hop % 2) * n_pad          # rows of H_hop      inside h_buf
    dst_off = ((hop + 1) % 2) * n_pad    # rows of H_{hop+1}  inside h_buf
    row0 = pl.multiple_of(i * tm, 8)

    s = s_ref[...]                       # (1, D)

    # ---- hop-0 bookkeeping --------------------------------------------------
    # Seed H_0 = X into ping-pong slot 0 (once, before any hop-0 tile is consumed).
    @pl.when((hop == 0) & (i == 0) & (j == 0))
    def _seed_h0():
        h_buf[pl.ds(0, n_pad), :] = x_ref[...]

    # Hop-0 gate contribution: out[rows_i] = sigmoid(X_i @ w_s) * X_i.
    @pl.when((hop == 0) & (j == 0))
    def _init_out_rows():
        x_i = x_ref[pl.ds(row0, tm), :]
        score0 = jax.nn.sigmoid(jnp.sum(x_i * s, axis=-1, keepdims=True))
        o_ref[pl.ds(row0, tm), :] = score0 * x_i

    # ---- streamed contraction ------------------------------------------------
    @pl.when(j == 0)
    def _zero_acc():
        acc_ref[...] = jnp.zeros_like(acc_ref)

    # acc += A01[rows_i, cols_j] @ (d^-1/2[cols_j] * H_hop[cols_j])   (bf16 MXU, f32 acc)
    col0 = pl.multiple_of(src_off + j * tk, 8)
    hs = dcon_ref[...] * h_buf[pl.ds(col0, tk), :]            # (tk, D) f32, VPU
    acc_ref[...] += jnp.dot(a_ref[...], hs.astype(jnp.bfloat16),
                            preferred_element_type=jnp.float32)

    # ---- finalize this row tile of H_{hop+1}, gate it, accumulate output ------
    @pl.when(j == nj - 1)
    def _finalize_rows():
        dcol = drow_ref[...]                                             # (tm, 1)
        hp = h_buf[pl.ds(pl.multiple_of(src_off + row0, 8), tm), :]      # H_hop[rows_i]
        # A_hat @ H = d^-1/2 * (A01 @ (d^-1/2 * H)) + d^-1 * H   (self-loop fused)
        h_new = dcol * acc_ref[...] + (dcol * dcol) * hp
        h_buf[pl.ds(pl.multiple_of(dst_off + row0, 8), tm), :] = h_new
        score = jax.nn.sigmoid(jnp.sum(h_new * s, axis=-1, keepdims=True))
        o_ref[pl.ds(row0, tm), :] += score * h_new


def rdagnn_forward(adj, features, gate_w, *, k: int, tm: int = 256, tk: int = 512):
    """adj: (N, N) raw 0/1 adjacency (no self-loops); features: (N, D); gate_w: (D,)."""
    assert k >= 1, "k must be >= 1"
    n, d = features.shape
    assert adj.shape == (n, n)

    # ---- O(N) glue: degrees of (A + I) and their rsqrt (no N^2 temporaries) ----
    deg = jnp.sum(adj.astype(jnp.float32), axis=-1) + 1.0
    dinv = jax.lax.rsqrt(deg)                                  # deg >= 1 always

    # ---- tiling / padding -------------------------------------------------------
    if n <= max(tm, tk):
        n_pad = _round_up(n, 8)
        tm_e = tk_e = n_pad             # single tile == full (padded) array
    else:
        tm_e, tk_e = tm, tk
        assert tm_e % 8 == 0 and tk_e % 128 == 0, "tiles must be (8,128)-aligned"
        n_pad = _round_up(n, math.lcm(tm_e, tk_e))

    pad = n_pad - n
    a01 = adj.astype(jnp.bfloat16)                             # 0/1 -> exact in bf16
    x = features.astype(jnp.float32)
    if pad:
        a01 = jnp.pad(a01, ((0, pad), (0, pad)))
        x = jnp.pad(x, ((0, pad), (0, 0)))
        dinv = jnp.pad(dinv, (0, pad))                         # padded rows: dinv = 0
    dinv_col = dinv.reshape(n_pad, 1).astype(jnp.float32)
    s2d = gate_w.reshape(1, d).astype(jnp.float32)

    grid = (k, n_pad // tm_e, n_pad // tk_e)
    kernel = functools.partial(_rdagnn_kernel, n_pad=n_pad, tm=tm_e, tk=tk_e)

    out = pl.pallas_call(
        kernel,
        out_shape=jax.ShapeDtypeStruct((n_pad, d), jnp.float32),
        grid=grid,
        in_specs=[
            pl.BlockSpec((tm_e, tk_e), lambda h, i, j: (i, j)),  # A tiles, streamed (bf16)
            pl.BlockSpec((n_pad, d), lambda h, i, j: (0, 0)),    # X, resident
            pl.BlockSpec((tm_e, 1), lambda h, i, j: (i, 0)),     # d^-1/2, output-row side
            pl.BlockSpec((tk_e, 1), lambda h, i, j: (j, 0)),     # d^-1/2, contraction side
            pl.BlockSpec((1, d), lambda h, i, j: (0, 0)),        # gate weight, resident
        ],
        out_specs=pl.BlockSpec((n_pad, d), lambda h, i, j: (0, 0)),  # resident accumulator
        scratch_shapes=[
            pltpu.VMEM((2 * n_pad, d), jnp.float32),             # H ping-pong buffers
            pltpu.VMEM((tm_e, d), jnp.float32),                  # per-row-tile matmul acc
        ],
        compiler_params=pltpu.CompilerParams(
            dimension_semantics=("arbitrary", "arbitrary", "arbitrary"),
            vmem_limit_bytes=48 * 1024 * 1024,
        ),
    )(a01, x, dinv_col, dinv_col, s2d)

    return out[:n].astype(features.dtype)


def rdagnn_reference(adj, features, gate_w, *, k: int, emulate_bf16: bool = True):
    """Pure-JAX reference.  With emulate_bf16=True it mirrors the kernel's mixed
    precision (bf16 adjacency / bf16 scaled-H MXU operands, f32 accumulation)."""
    n, d = features.shape
    a = adj.astype(jnp.float32)
    deg = jnp.sum(a, axis=-1) + 1.0
    dinv = jax.lax.rsqrt(deg)[:, None]
    if emulate_bf16:
        a = a.astype(jnp.bfloat16).astype(jnp.float32)         # exact for 0/1 entries
    w = gate_w.reshape(d, 1).astype(jnp.float32)
    h = features.astype(jnp.float32)
    out = jax.nn.sigmoid(h @ w) * h
    for _ in range(k):
        hs = dinv * h
        if emulate_bf16:
            hs = hs.astype(jnp.bfloat16).astype(jnp.float32)
        h = dinv * (a @ hs) + (dinv * dinv) * h                # == A_hat @ h
        out = out + jax.nn.sigmoid(h @ w) * h
    return out.astype(features.dtype)


if __name__ == "__main__":
    key = jax.random.PRNGKey(0)
    k_feat, k_adj, k_gate = jax.random.split(key, 3)

    N = 380        # not a tile multiple -> exercises the padding path
    OUT_DIM = 32   # the layer's out_dim
    K = 2          # propagation hops

    features = jax.random.normal(k_feat, (N, OUT_DIM), dtype=jnp.float32)
    # Symmetric random 0/1 adjacency, no self-loops (self-loop fused in the kernel).
    raw = jax.random.uniform(k_adj, (N, N)) < 0.1
    adj = jnp.triu(raw, 1)
    adj = (adj | adj.T).astype(jnp.float32)
    # Gate weight: nn.Linear(out_dim, 1, bias=False)-style uniform fan-in init.
    bound = 1.0 / (OUT_DIM ** 0.5)
    gate_w = jax.random.uniform(k_gate, (OUT_DIM,), minval=-bound, maxval=bound,
                                dtype=jnp.float32)

    # Small tiles so even this toy graph exercises the (hop, row, contraction) grid.
    out = rdagnn_forward(adj, features, gate_w, k=K, tm=128, tk=128)
    out = jax.block_until_ready(out)

    ref_mixed = rdagnn_reference(adj, features, gate_w, k=K, emulate_bf16=True)
    ref_f32 = rdagnn_reference(adj, features, gate_w, k=K, emulate_bf16=False)
    assert out.shape == (N, OUT_DIM)
    assert jnp.allclose(out, ref_mixed, atol=1e-4, rtol=1e-4), "mismatch vs mixed-precision reference"
    assert jnp.allclose(out, ref_f32, atol=2e-2, rtol=2e-2), "mismatch vs f32 reference"

    print("KERNEL_OK")
</pallas_src>

<mosaic_0001>
module attributes {stable_mosaic.version = 11 : i64} {
  func.func @_rdagnn_kernel(%arg0: i32, %arg1: i32, %arg2: i32, %arg3: memref<128x128xbf16, #tpu.memory_space<vmem>>, %arg4: memref<384x32xf32, #tpu.memory_space<vmem>>, %arg5: memref<128x1xf32, #tpu.memory_space<vmem>>, %arg6: memref<128x1xf32, #tpu.memory_space<vmem>>, %arg7: memref<1x32xf32, #tpu.memory_space<vmem>>, %arg8: memref<384x32xf32, #tpu.memory_space<vmem>>, %arg9: memref<768x32xf32, #tpu.memory_space<vmem>>, %arg10: memref<128x32xf32, #tpu.memory_space<vmem>>) attributes {dimension_semantics = [#tpu.dimension_semantics<arbitrary>, #tpu.dimension_semantics<arbitrary>, #tpu.dimension_semantics<arbitrary>], iteration_bounds = array<i64: 2, 3, 3>, scalar_prefetch = 0 : i64, scratch_operands = 2 : i64, tpu.core_type = #tpu.core_type<tc>, window_params = [{transform_indices = @transform_0, window_bounds = array<i64: 128, 128>}, {pipeline_mode = #tpu.pipeline_mode<synchronous>, transform_indices = @transform_1, window_bounds = array<i64: 384, 32>}, {transform_indices = @transform_2, window_bounds = array<i64: 128, 1>}, {transform_indices = @transform_3, window_bounds = array<i64: 128, 1>}, {pipeline_mode = #tpu.pipeline_mode<synchronous>, transform_indices = @transform_4, window_bounds = array<i64: 1, 32>}, {pipeline_mode = #tpu.pipeline_mode<synchronous>, transform_indices = @transform_5, window_bounds = array<i64: 384, 32>}]} {
    %c2_i32 = arith.constant 2 : i32
    %c0_i32 = arith.constant 0 : i32
    %0 = arith.cmpi eq, %c2_i32, %c0_i32 : i32
    %c1_i32 = arith.constant 1 : i32
    %1 = arith.select %0, %c1_i32, %c2_i32 : i32
    %2 = arith.remsi %arg0, %1 : i32
    %c0_i32_0 = arith.constant 0 : i32
    %3 = arith.cmpi ne, %2, %c0_i32_0 : i32
    %c0_i32_1 = arith.constant 0 : i32
    %4 = arith.cmpi slt, %2, %c0_i32_1 : i32
    %c0_i32_2 = arith.constant 0 : i32
    %5 = arith.cmpi slt, %1, %c0_i32_2 : i32
    %6 = arith.xori %4, %5 : i1
    %7 = arith.andi %6, %3 : i1
    %8 = arith.addi %2, %1 : i32
    %9 = arith.select %7, %8, %2 : i32
    %c384_i32 = arith.constant 384 : i32
    %10 = arith.muli %9, %c384_i32 : i32
    %c1_i32_3 = arith.constant 1 : i32
    %11 = arith.addi %arg0, %c1_i32_3 : i32
    %c2_i32_4 = arith.constant 2 : i32
    %c0_i32_5 = arith.constant 0 : i32
    %12 = arith.cmpi eq, %c2_i32_4, %c0_i32_5 : i32
    %c1_i32_6 = arith.constant 1 : i32
    %13 = arith.select %12, %c1_i32_6, %c2_i32_4 : i32
    %14 = arith.remsi %11, %13 : i32
    %c0_i32_7 = arith.constant 0 : i32
    %15 = arith.cmpi ne, %14, %c0_i32_7 : i32
    %c0_i32_8 = arith.constant 0 : i32
    %16 = arith.cmpi slt, %14, %c0_i32_8 : i32
    %c0_i32_9 = arith.constant 0 : i32
    %17 = arith.cmpi slt, %13, %c0_i32_9 : i32
    %18 = arith.xori %16, %17 : i1
    %19 = arith.andi %18, %15 : i1
    %20 = arith.addi %14, %13 : i32
    %21 = arith.select %19, %20, %14 : i32
    %c384_i32_10 = arith.constant 384 : i32
    %22 = arith.muli %21, %c384_i32_10 : i32
    %c128_i32 = arith.constant 128 : i32
    %23 = arith.muli %arg1, %c128_i32 : i32
    %24 = tpu.assume_multiple %23, 8 : i32
    %c0 = arith.constant 0 : index
    %c0_11 = arith.constant 0 : index
    %25 = vector.load %arg7[%c0, %c0_11] : memref<1x32xf32, #tpu.memory_space<vmem>>, vector<1x32xf32>
    %c0_i32_12 = arith.constant 0 : i32
    %26 = arith.cmpi eq, %arg0, %c0_i32_12 : i32
    %c0_i32_13 = arith.constant 0 : i32
    %27 = arith.cmpi eq, %arg1, %c0_i32_13 : i32
    %28 = arith.andi %26, %27 : i1
    %c0_i32_14 = arith.constant 0 : i32
    %29 = arith.cmpi eq, %arg2, %c0_i32_14 : i32
    %30 = arith.andi %28, %29 : i1
    %31 = arith.extui %30 : i1 to i32
    %c0_i32_15 = arith.constant 0 : i32
    %32 = arith.cmpi ne, %31, %c0_i32_15 : i32
    scf.if %32 {
      %c0_33 = arith.constant 0 : index
      %c0_34 = arith.constant 0 : index
      %58 = vector.load %arg4[%c0_33, %c0_34] : memref<384x32xf32, #tpu.memory_space<vmem>>, vector<384x32xf32>
      %c0_35 = arith.constant 0 : index
      %c0_36 = arith.constant 0 : index
      %59 = vector.load %arg9[%c0_35, %c0_36] : memref<768x32xf32, #tpu.memory_space<vmem>>, vector<384x32xf32>
      tpu.vector_store %arg9[%c0_35, %c0_36], %58 {strides = array<i32>} : memref<768x32xf32, #tpu.memory_space<vmem>>, vector<384x32xf32>,
    } else {
    }
    %c0_i32_16 = arith.constant 0 : i32
    %33 = arith.cmpi eq, %arg0, %c0_i32_16 : i32
    %c0_i32_17 = arith.constant 0 : i32
    %34 = arith.cmpi eq, %arg2, %c0_i32_17 : i32
    %35 = arith.andi %33, %34 : i1
    %36 = arith.extui %35 : i1 to i32
    %c0_i32_18 = arith.constant 0 : i32
    %37 = arith.cmpi ne, %36, %c0_i32_18 : i32
    scf.if %37 {
      %58 = arith.index_cast %24 : i32 to index
      %c0_33 = arith.constant 0 : index
      %59 = vector.load %arg4[%58, %c0_33] : memref<384x32xf32, #tpu.memory_space<vmem>>, vector<128x32xf32>
      %60 = vector.broadcast %25 : vector<1x32xf32> to vector<128x32xf32>
      %61 = arith.mulf %59, %60 : vector<128x32xf32>
      %cst_34 = arith.constant dense<0.000000e+00> : vector<128xf32>
      %62 = vector.multi_reduction <add>, %61, %cst_34 [1] : vector<128x32xf32> to vector<128xf32>
      %63 = vector.shape_cast %62 : vector<128xf32> to vector<128x1xf32>
      %64 = arith.negf %63 : vector<128x1xf32>
      %65 = math.exp %64 : vector<128x1xf32>
      %cst_35 = arith.constant 1.000000e+00 : f32
      %66 = vector.broadcast %cst_35 : f32 to vector<128x1xf32>
      %67 = arith.addf %66, %65 : vector<128x1xf32>
      %68 = arith.divf %66, %67 : vector<128x1xf32>
      %69 = vector.broadcast %68 : vector<128x1xf32> to vector<128x32xf32>
      %70 = arith.mulf %69, %59 : vector<128x32xf32>
      %71 = arith.index_cast %24 : i32 to index
      %c0_36 = arith.constant 0 : index
      %72 = vector.load %arg8[%71, %c0_36] : memref<384x32xf32, #tpu.memory_space<vmem>>, vector<128x32xf32>
      tpu.vector_store %arg8[%71, %c0_36], %70 {strides = array<i32>} : memref<384x32xf32, #tpu.memory_space<vmem>>, vector<128x32xf32>,
    } else {
    }
    %c0_i32_19 = arith.constant 0 : i32
    %38 = arith.cmpi eq, %arg2, %c0_i32_19 : i32
    %39 = arith.extui %38 : i1 to i32
    %c0_i32_20 = arith.constant 0 : i32
    %40 = arith.cmpi ne, %39, %c0_i32_20 : i32
    scf.if %40 {
      %cst_33 = arith.constant 0.000000e+00 : f32
      %58 = vector.broadcast %cst_33 : f32 to vector<128x32xf32>
      %c0_34 = arith.constant 0 : index
      %c0_35 = arith.constant 0 : index
      %59 = vector.load %arg10[%c0_34, %c0_35] : memref<128x32xf32, #tpu.memory_space<vmem>>, vector<128x32xf32>
      tpu.vector_store %arg10[%c0_34, %c0_35], %58 {strides = array<i32>} : memref<128x32xf32, #tpu.memory_space<vmem>>, vector<128x32xf32>,
    } else {
    }
    %c128_i32_21 = arith.constant 128 : i32
    %41 = arith.muli %arg2, %c128_i32_21 : i32
    %42 = arith.addi %10, %41 : i32
    %43 = tpu.assume_multiple %42, 8 : i32
    %c0_22 = arith.constant 0 : index
    %c0_23 = arith.constant 0 : index
    %44 = vector.load %arg6[%c0_22, %c0_23] : memref<128x1xf32, #tpu.memory_space<vmem>>, vector<128x1xf32>
    %45 = arith.index_cast %43 : i32 to index
    %c0_24 = arith.constant 0 : index
    %46 = vector.load %arg9[%45, %c0_24] : memref<768x32xf32, #tpu.memory_space<vmem>>, vector<128x32xf32>
    %47 = vector.broadcast %44 : vector<128x1xf32> to vector<128x32xf32>
    %48 = arith.mulf %47, %46 : vector<128x32xf32>
    %c0_25 = arith.constant 0 : index
    %c0_26 = arith.constant 0 : index
    %49 = vector.load %arg10[%c0_25, %c0_26] : memref<128x32xf32, #tpu.memory_space<vmem>>, vector<128x32xf32>
    %c0_27 = arith.constant 0 : index
    %c0_28 = arith.constant 0 : index
    %50 = vector.load %arg3[%c0_27, %c0_28] : memref<128x128xbf16, #tpu.memory_space<vmem>>, vector<128x128xbf16>
    %51 = arith.truncf %48 : vector<128x32xf32> to vector<128x32xbf16>
    %cst = arith.constant dense<0.000000e+00> : vector<128x32xf32>
    %52 = tpu.matmul %50, %51, %cst {dimension_numbers = #tpu.dot_dimension_numbers<[1], [0], [0], [1], [0, 0, 1, 1], [], []>} : vector<128x128xbf16>, vector<128x32xbf16>, vector<128x32xf32> -> vector<128x32xf32>
    %53 = arith.addf %49, %52 : vector<128x32xf32>
    %c0_29 = arith.constant 0 : index
    %c0_30 = arith.constant 0 : index
    %54 = vector.load %arg10[%c0_29, %c0_30] : memref<128x32xf32, #tpu.memory_space<vmem>>, vector<128x32xf32>
    tpu.vector_store %arg10[%c0_29, %c0_30], %53 {strides = array<i32>} : memref<128x32xf32, #tpu.memory_space<vmem>>, vector<128x32xf32>,
    %c2_i32_31 = arith.constant 2 : i32
    %55 = arith.cmpi eq, %arg2, %c2_i32_31 : i32
    %56 = arith.extui %55 : i1 to i32
    %c0_i32_32 = arith.constant 0 : i32
    %57 = arith.cmpi ne, %56, %c0_i32_32 : i32
    scf.if %57 {
      %c0_33 = arith.constant 0 : index
      %c0_34 = arith.constant 0 : index
      %58 = vector.load %arg5[%c0_33, %c0_34] : memref<128x1xf32, #tpu.memory_space<vmem>>, vector<128x1xf32>
      %59 = arith.addi %10, %24 : i32
      %60 = tpu.assume_multiple %59, 8 : i32
      %61 = arith.index_cast %60 : i32 to index
      %c0_35 = arith.constant 0 : index
      %62 = vector.load %arg9[%61, %c0_35] : memref<768x32xf32, #tpu.memory_space<vmem>>, vector<128x32xf32>
      %c0_36 = arith.constant 0 : index
      %c0_37 = arith.constant 0 : index
      %63 = vector.load %arg10[%c0_36, %c0_37] : memref<128x32xf32, #tpu.memory_space<vmem>>, vector<128x32xf32>
      %64 = vector.broadcast %58 : vector<128x1xf32> to vector<128x32xf32>
      %65 = arith.mulf %64, %63 : vector<128x32xf32>
      %66 = arith.mulf %58, %58 : vector<128x1xf32>
      %67 = vector.broadcast %66 : vector<128x1xf32> to vector<128x32xf32>
      %68 = arith.mulf %67, %62 : vector<128x32xf32>
      %69 = arith.addf %65, %68 : vector<128x32xf32>
      %70 = arith.addi %22, %24 : i32
      %71 = tpu.assume_multiple %70, 8 : i32
      %72 = arith.index_cast %71 : i32 to index
      %c0_38 = arith.constant 0 : index
      %73 = vector.load %arg9[%72, %c0_38] : memref<768x32xf32, #tpu.memory_space<vmem>>, vector<128x32xf32>
      tpu.vector_store %arg9[%72, %c0_38], %69 {strides = array<i32>} : memref<768x32xf32, #tpu.memory_space<vmem>>, vector<128x32xf32>,
      %74 = vector.broadcast %25 : vector<1x32xf32> to vector<128x32xf32>
      %75 = arith.mulf %69, %74 : vector<128x32xf32>
      %cst_39 = arith.constant dense<0.000000e+00> : vector<128xf32>
      %76 = vector.multi_reduction <add>, %75, %cst_39 [1] : vector<128x32xf32> to vector<128xf32>
      %77 = vector.shape_cast %76 : vector<128xf32> to vector<128x1xf32>
      %78 = arith.negf %77 : vector<128x1xf32>
      %79 = math.exp %78 : vector<128x1xf32>
      %cst_40 = arith.constant 1.000000e+00 : f32
      %80 = vector.broadcast %cst_40 : f32 to vector<128x1xf32>
      %81 = arith.addf %80, %79 : vector<128x1xf32>
      %82 = arith.divf %80, %81 : vector<128x1xf32>
      %83 = arith.index_cast %24 : i32 to index
      %c0_41 = arith.constant 0 : index
      %84 = vector.load %arg8[%83, %c0_41] : memref<384x32xf32, #tpu.memory_space<vmem>>, vector<128x32xf32>
      %85 = vector.broadcast %82 : vector<128x1xf32> to vector<128x32xf32>
      %86 = arith.mulf %85, %69 : vector<128x32xf32>
      %87 = arith.addf %84, %86 : vector<128x32xf32>
      %88 = arith.index_cast %24 : i32 to index
      %c0_42 = arith.constant 0 : index
      %89 = vector.load %arg8[%88, %c0_42] : memref<384x32xf32, #tpu.memory_space<vmem>>, vector<128x32xf32>
      tpu.vector_store %arg8[%88, %c0_42], %87 {strides = array<i32>} : memref<384x32xf32, #tpu.memory_space<vmem>>, vector<128x32xf32>,
    } else {
    }
    return
  }
  func.func @transform_0(%arg0: i32, %arg1: i32, %arg2: i32) -> (i32, i32) {
    %c0_i32 = arith.constant 0 : i32
    return %arg1, %arg2 : i32, i32
  }
  func.func @transform_1(%arg0: i32, %arg1: i32, %arg2: i32) -> (i32, i32) {
    %c0_i32 = arith.constant 0 : i32
    %c0_i32_0 = arith.constant 0 : i32
    %c0_i32_1 = arith.constant 0 : i32
    return %c0_i32, %c0_i32_0 : i32, i32
  }
  func.func @transform_2(%arg0: i32, %arg1: i32, %arg2: i32) -> (i32, i32) {
    %c0_i32 = arith.constant 0 : i32
    %c0_i32_0 = arith.constant 0 : i32
    return %arg1, %c0_i32 : i32, i32
  }
  func.func @transform_3(%arg0: i32, %arg1: i32, %arg2: i32) -> (i32, i32) {
    %c0_i32 = arith.constant 0 : i32
    %c0_i32_0 = arith.constant 0 : i32
    return %arg2, %c0_i32 : i32, i32
  }
  func.func @transform_4(%arg0: i32, %arg1: i32, %arg2: i32) -> (i32, i32) {
    %c0_i32 = arith.constant 0 : i32
    %c0_i32_0 = arith.constant 0 : i32
    %c0_i32_1 = arith.constant 0 : i32
    return %c0_i32, %c0_i32_0 : i32, i32
  }
  func.func @transform_5(%arg0: i32, %arg1: i32, %arg2: i32) -> (i32, i32) {
    %c0_i32 = arith.constant 0 : i32
    %c0_i32_0 = arith.constant 0 : i32
    %c0_i32_1 = arith.constant 0 : i32
    return %c0_i32, %c0_i32_0 : i32, i32
  }
}

</mosaic_0001>

<bundles_post_ra>
// kernel: tpu_custom_call.1
= control target key start
LH: loop header
LB: loop body
LE: loop exit
PB: predicated region body
PF: predicated region fallthrough
CT: control target
= control target key end

     0   :  { %s3048_s0 = inlined_call_operand.vmem [shape: bf16[384,384], index: 0, kind: input, shape index: {}]   ;;  %s3049_s1 = inlined_call_operand.vmem [shape: f32[384,32], index: 1, kind: input, shape index: {}]   ;;  %s3050_s2 = inlined_call_operand.vmem [shape: f32[384,1], index: 2, kind: input, shape index: {}]   ;;  %s3051_s3 = inlined_call_operand.vmem [shape: f32[384,1], index: 3, kind: input, shape index: {}]   ;;  %s3052_s4 = inlined_call_operand.vmem [shape: f32[1,32], index: 4, kind: input, shape index: {}]   ;;  %s3053_s5 = inlined_call_operand.vmem [shape: f32[384,32], index: 5, kind: output, shape index: {}]  }
   0x1   :  { %3054 = sst [smem:[#allocation6_spill]] %s3048_s0 }
   0x2   :  { %3055 = sst [smem:[#allocation7_spill]] %s3052_s4 }
   0x3   :  { %s2180_s18 = smov 0   ;;  %s2182_s19 = smov 0  }
   0x4   :  { %s2184_s20 = smov 0   ;;  %s2186_s21 = smov 0  }
   0x5   :  { %s2188_s22 = smov 0   ;;  %s2190_s23 = smov 0  }
   0x6   :  { %s2192_s24 = smov 0   ;;  %s2194_s25 = smov 0  }
   0x7   :  { %s2196_s26 = smov 0  }
   0x8 LB: > { %s27_s27 = sadd.s32 1, %s2133_s23  ;;  %s30_s28 = sadd.s32 1, %s2137_s24  ;;  %s2145_s26 = sphi %s2196_s26, %s15_s26   ;;  %s2141_s25 = sphi %s2194_s25, %s3067_s25   ;;  %s2137_s24 = sphi %s2192_s24, %s3066_s24   ;;  %s2133_s23 = sphi %s2190_s23, %s3065_s23   ;;  %s2129_s22 = sphi %s2188_s22, %s3064_s22   ;;  %s2125_s21 = sphi %s2186_s21, %s3063_s21   ;;  %s2121_s20 = sphi %s2184_s20, %s3062_s20   ;;  %s2117_s19 = sphi %s2182_s19, %s3061_s19   ;;  %s2113_s18 = sphi %s2180_s18, %s3060_s18  }
   0x9   : > { %p28_p0 = scmp.ge.s32.totalorder %s27_s27, 3  ;;  %p50_p1 = scmp.ne.s32.totalorder %s2117_s19, %s2113_s18 }
   0xa   : > { %p51_p2 = scmp.eq.s32.totalorder %s2145_s26, 0  ;;  %s34_s29 = sadd.s32 1, %s2141_s25 }
   0xb   : > { %s3069_s27 = smov (%p28_p0, %s27_s27), 0  ;;  %s3071_s28 = smov (!%p28_p0, %s30_s28), %s2137_s24 }
   0xc   : > { %p32_p3 = scmp.ge.s32.totalorder %s3071_s28, 3  ;;  %s39_s30 = ssub.s32 %s2133_s23, %s3069_s27 }
   0xd   : > { %p52_p4 = por %p51_p2, %p50_p1  ;;  %s43_s7 = sadd.s32 1, %s2117_s19 }
   0xe   : > { %s3073_s28 = smov (%p32_p3, %s3071_s28), 0  ;;  %s3075_s29 = smov (!%p32_p3, %s34_s29), %s2141_s25 }
   0xf   : > { %s38_s6 = ssub.s32 %s2137_s24, %s3073_s28  ;;  %p36_p5 = scmp.ge.s32.totalorder %s3075_s29, 2 }
  0x10   : > { %s40_s8 = sor.u32 %s39_s30, %s38_s6  ;;  %p1732_p7 = scmp.ge.s32.totalorder %s2145_s26, 18 }
  0x11   : > { %p41_p6 = scmp.eq.s32.totalorder %s40_s8, 0  ;;  %s3077_s29 = smov (%p36_p5, %s3075_s29), 0 }
  0x12   : > { %3056 = sst [smem:[#allocation5_spill]] %s3077_s29  ;;  %197 = sbr.rel (%p1732_p7) target bundleno = 43 (0x2b), region = 24 }
  0x13   : > { %s2245_s9 = scalar_select %p41_p6, %s2117_s19, %s43_s7  }
  0x17   : > { %200 = sbr.rel (!%p52_p4) target bundleno = 43 (0x2b), region = 28  ;;  %s202_s10 = sand.u32 (%p52_p4), 1, %s2117_s19  }
  0x18   : > { %s1859_s11 = smul.u32 (%p52_p4), 48, %s2137_s24  ;;  %s1733_s12 = sshll.u32 (%p52_p4), %s202_s10, 6 }
  0x19   : > { %s3057_s0 = sld [smem:[#allocation6_spill]] (%p52_p4)  ;;  %s204_s30 = scalar_lea.vmem (%p52_p4), [#allocation4], %s1733_s12 }
  0x1a   : > { %s207_s13 = sadd.s32 (%p52_p4), %s2133_s23, %s1859_s11 }
  0x1b   : > { %s1736_s14 = sshll.u32 (%p52_p4), %s207_s13, 2 }
  0x1f   : > { %s2254_s17 = scalar_lea.vmem %s3057_s0, %s1736_s14 }
  0x20   : > { %v226_v0 = vld [vmem:[%s2254_s17] sm:$0xf]  ;;  %v228_v1 = vld [vmem:[%s2254_s17 + $0xc] sm:$0xf]  ;;  %v230_v2 = vld [vmem:[%s2254_s17 + $0x18] sm:$0xf] }
  0x21   : > { %227 = vst [vmem:[%s204_s30] sm:$0xf] %v226_v0  ;;  %229 = vst [vmem:[%s204_s30 + $0x4] sm:$0xf] %v228_v1  ;;  %v232_v3 = vld [vmem:[%s2254_s17 + $0x24] sm:$0xf] }
  0x22   : > { %231 = vst [vmem:[%s204_s30 + $0x8] sm:$0xf] %v230_v2  ;;  %v234_v4 = vld [vmem:[%s2254_s17 + $0x30] sm:$0xf]  ;;  %v236_v5 = vld [vmem:[%s2254_s17 + $0x3c] sm:$0xf] }
  0x23   : > { %233 = vst [vmem:[%s204_s30 + $0xc] sm:$0xf] %v232_v3  ;;  %235 = vst [vmem:[%s204_s30 + $0x10] sm:$0xf] %v234_v4  ;;  %v238_v6 = vld [vmem:[%s2254_s17 + $0x48] sm:$0xf] }
  0x24   : > { %237 = vst [vmem:[%s204_s30 + $0x14] sm:$0xf] %v236_v5  ;;  %v240_v7 = vld [vmem:[%s2254_s17 + $0x54] sm:$0xf]  ;;  %v242_v8 = vld [vmem:[%s2254_s17 + $0x60] sm:$0xf] }
  0x25   : > { %239 = vst [vmem:[%s204_s30 + $0x18] sm:$0xf] %v238_v6  ;;  %241 = vst [vmem:[%s204_s30 + $0x1c] sm:$0xf] %v240_v7  ;;  %v244_v9 = vld [vmem:[%s2254_s17 + $0x6c] sm:$0xf] }
  0x26   : > { %243 = vst [vmem:[%s204_s30 + $0x20] sm:$0xf] %v242_v8  ;;  %v246_v10 = vld [vmem:[%s2254_s17 + $0x78] sm:$0xf]  ;;  %v248_v11 = vld [vmem:[%s2254_s17 + $0x84] sm:$0xf] }
  0x27   : > { %245 = vst [vmem:[%s204_s30 + $0x24] sm:$0xf] %v244_v9  ;;  %247 = vst [vmem:[%s204_s30 + $0x28] sm:$0xf] %v246_v10  ;;  %v250_v12 = vld [vmem:[%s2254_s17 + $0x90] sm:$0xf] }
  0x28   : > { %249 = vst [vmem:[%s204_s30 + $0x2c] sm:$0xf] %v248_v11  ;;  %v252_v13 = vld [vmem:[%s2254_s17 + $0x9c] sm:$0xf]  ;;  %v254_v14 = vld [vmem:[%s2254_s17 + $0xa8] sm:$0xf] }
  0x29   : > { %251 = vst [vmem:[%s204_s30 + $0x30] sm:$0xf] %v250_v12  ;;  %253 = vst [vmem:[%s204_s30 + $0x34] sm:$0xf] %v252_v13  ;;  %v256_v15 = vld [vmem:[%s2254_s17 + $0xb4] sm:$0xf] }
  0x2a   : > { %255 = vst [vmem:[%s204_s30 + $0x38] sm:$0xf] %v254_v14  ;;  %257 = vst [vmem:[%s204_s30 + $0x3c] sm:$0xf] %v256_v15 }
  0x2b PF: > { %p1737_p8 = scmp.ge.s32.totalorder %s2145_s26, 1  ;;  %p330_p9 = scmp.lt.s32.totalorder %s2145_s26, 19 }
  0x2d   : > { %p331_p10 = pnand %p1737_p8, %p330_p9 }
  0x2e   : > { %s337_s6 = sand.u32 (!%p331_p10), 1, %s2113_s18   ;;  %s1739_s7 = sshll.u32 (!%p331_p10), %s2125_s21, 4 }
  0x2f   : > { %334 = sbr.rel (%p331_p10) target bundleno = 1086 (0x43e), region = 77  ;;  %s3058_s4 = sld [smem:[#allocation7_spill]] (!%p331_p10) }
  0x30   : > { %s2281_s11 = sshll.u32 (!%p331_p10), %s337_s6, 6  ;;  %p371_p11 = scmp.lt.s32.totalorder (!%p331_p10), %s1739_s7, 47 }
  0x31   : > { %s1741_s12 = sshll.u32 (!%p331_p10), %s2121_s20, 4  ;;  %p383_p13 = scmp.lt.s32.totalorder (!%p331_p10), %s2129_s22, 0 }
  0x32   : > { %p377_p12 = scmp.lt.s32.totalorder (!%p331_p10), %s1741_s12, 47  ;;  %s384_s14 = ssub.s32 (!%p331_p10), 0, %s2129_s22 }
  0x33   : > { %s1743_s17 = smin.u32 (!%p331_p10), %s2129_s22, %s384_s14  ;;  %s396_s6 = sadd.s32 (!%p331_p10), 1, %s2129_s22 }
  0x34   : > { %s3079_s7 = smov (!%p371_p11, %s1739_s7), 47  ;;  %s3081_s12 = smov (!%p377_p12, %s1741_s12), 47 }
  0x35   : > { %v2279_v16 = vld [vmem:[%s3058_s4] sm:$0x1]  ;;  %s1740_s13 = sshll.u32 %s3079_s7, 3  ;;  %s386_s30 = sand.u32 1, %s1743_s17  }
  0x36   : > { %s2289_s18 = scalar_lea.vmem %s3050_s2, %s1740_s13  ;;  %s1742_s8 = sshll.u32 %s3081_s12, 3 }
  0x37   : > { %s387_s10 = ssub.s32 0, %s386_s30  ;;  %s2296_s29 = scalar_lea.vmem %s3051_s3, %s1742_s8 }
  0x38   : > { %p397_p0 = scmp.lt.s32.totalorder %s396_s6, 0  ;;  %s3083_s10 = smov (!%p383_p13, %s387_s10), %s386_s30 }
  0x39   : > { %s398_s7 = ssub.s32 0, %s396_s6  ;;  %s2299_s15 = sshll.u32 %s2125_s21, 7 }
  0x3a   : > { %p1745_p1 = scmp.lt.s32.totalorder %s3083_s10, 0  ;;  %s393_s13 = sadd.s32 2, %s3083_s10 }
  0x3b   : > { %s1746_s14 = smin.u32 %s398_s7, %s396_s6  ;;  %p412_p2 = scmp.eq.s32.totalorder %s2129_s22, 0 }
  0x3c   : > { %s3085_s13 = smov (!%p1745_p1, %s393_s13), %s3083_s10  ;;  %s400_s12 = sand.u32 1, %s1746_s14  }
  0x3d   : > { %p413_p3 = scmp.eq.s32.totalorder %s2125_s21, 0  ;;  %s395_s0 = smul.u32 384, %s3085_s13 }
  0x3e   : > { %s401_s4 = ssub.s32 0, %s400_s12  ;;  %p416_p5 = scmp.eq.s32.totalorder %s2121_s20, 0 }
  0x3f   : > { %s3087_s4 = smov (!%p397_p0, %s401_s4), %s400_s12  ;;  %p414_p4 = pnand %p413_p3, %p412_p2 }
  0x40   : > { %p1748_p6 = scmp.lt.s32.totalorder %s3087_s4, 0  ;;  %s407_s16 = sadd.s32 2, %s3087_s4 }
  0x41   : > { %p415_p7 = pneg %p414_p4  ;;  %s2315_s30 = scalar_lea.vmem [#allocation4], %s2281_s11 }
  0x42   : > { %s3089_s16 = smov (!%p1748_p6, %s407_s16), %s3087_s4 }
  0x43   : > { %p417_p8 = pnand %p416_p5, %p415_p7  ;;  %s409_s17 = smul.u32 384, %s3089_s16 }
  0x45   : > { %420 = sbr.rel (%p417_p8) target bundleno = 99 (0x63), region = 85 }
  0x4a   : > { %v421_v17 = vld [vmem:[%s3049_s1] sm:$0xff]  ;;  %vm469_vm0 = vcmask 261120   ;;  %v422_v18 = vld [vmem:[%s3049_s1 + $0x8] sm:$0xff]  ;;  %v423_v19 = vld [vmem:[%s3049_s1 + $0x10] sm:$0xff] }
  0x4b   : > { %470 = vst.msk [vmem:[#allocation2] sm:$0xff] %vm469_vm0, %v421_v17  ;;  %471 = vst.msk [vmem:[#allocation2 + $0x8] sm:$0xff] %vm469_vm0, %v422_v18  ;;  %v424_v20 = vld [vmem:[%s3049_s1 + $0x18] sm:$0xff]  ;;  %v425_v21 = vld [vmem:[%s3049_s1 + $0x20] sm:$0xff] }
  0x4c   : > { %472 = vst.msk [vmem:[#allocation2 + $0x10] sm:$0xff] %vm469_vm0, %v423_v19  ;;  %v426_v22 = vld [vmem:[%s3049_s1 + $0x28] sm:$0xff]  ;;  %473 = vst.msk [vmem:[#allocation2 + $0x18] sm:$0xff] %vm469_vm0, %v424_v20  ;;  %v427_v23 = vld [vmem:[%s3049_s1 + $0x30] sm:$0xff] }
  0x4d   : > { %474 = vst.msk [vmem:[#allocation2 + $0x20] sm:$0xff] %vm469_vm0, %v425_v21  ;;  %475 = vst.msk [vmem:[#allocation2 + $0x28] sm:$0xff] %vm469_vm0, %v426_v22  ;;  %v428_v24 = vld [vmem:[%s3049_s1 + $0x38] sm:$0xff]  ;;  %v429_v25 = vld [vmem:[%s3049_s1 + $0x40] sm:$0xff] }
  0x4e   : > { %476 = vst.msk [vmem:[#allocation2 + $0x30] sm:$0xff] %vm469_vm0, %v427_v23  ;;  %477 = vst.msk [vmem:[#allocation2 + $0x38] sm:$0xff] %vm469_vm0, %v428_v24  ;;  %v430_v26 = vld [vmem:[%s3049_s1 + $0x48] sm:$0xff]  ;;  %v431_v27 = vld [vmem:[%s3049_s1 + $0x50] sm:$0xff] }
  0x4f   : > { %478 = vst.msk [vmem:[#allocation2 + $0x40] sm:$0xff] %vm469_vm0, %v429_v25  ;;  %v432_v28 = vld [vmem:[%s3049_s1 + $0x58] sm:$0xff]  ;;  %479 = vst.msk [vmem:[#allocation2 + $0x48] sm:$0xff] %vm469_vm0, %v430_v26  ;;  %v433_v29 = vld [vmem:[%s3049_s1 + $0x60] sm:$0xff] }
  0x50   : > { %480 = vst.msk [vmem:[#allocation2 + $0x50] sm:$0xff] %vm469_vm0, %v431_v27  ;;  %481 = vst.msk [vmem:[#allocation2 + $0x58] sm:$0xff] %vm469_vm0, %v432_v28  ;;  %v434_v30 = vld [vmem:[%s3049_s1 + $0x68] sm:$0xff]  ;;  %v435_v31 = vld [vmem:[%s3049_s1 + $0x70] sm:$0xff] }
  0x51   : > { %482 = vst.msk [vmem:[#allocation2 + $0x60] sm:$0xff] %vm469_vm0, %v433_v29  ;;  %483 = vst.msk [vmem:[#allocation2 + $0x68] sm:$0xff] %vm469_vm0, %v434_v30  ;;  %v436_v32 = vld [vmem:[%s3049_s1 + $0x78] sm:$0xff]  ;;  %v437_v33 = vld [vmem:[%s3049_s1 + $0x80] sm:$0xff] }
  0x52   : > { %484 = vst.msk [vmem:[#allocation2 + $0x70] sm:$0xff] %vm469_vm0, %v435_v31  ;;  %v438_v34 = vld [vmem:[%s3049_s1 + $0x88] sm:$0xff]  ;;  %485 = vst.msk [vmem:[#allocation2 + $0x78] sm:$0xff] %vm469_vm0, %v436_v32  ;;  %v439_v35 = vld [vmem:[%s3049_s1 + $0x90] sm:$0xff] }
  0x53   : > { %486 = vst.msk [vmem:[#allocation2 + $0x80] sm:$0xff] %vm469_vm0, %v437_v33  ;;  %487 = vst.msk [vmem:[#allocation2 + $0x88] sm:$0xff] %vm469_vm0, %v438_v34  ;;  %v440_v36 = vld [vmem:[%s3049_s1 + $0x98] sm:$0xff]  ;;  %v441_v37 = vld [vmem:[%s3049_s1 + $0xa0] sm:$0xff] }
  0x54   : > { %488 = vst.msk [vmem:[#allocation2 + $0x90] sm:$0xff] %vm469_vm0, %v439_v35  ;;  %489 = vst.msk [vmem:[#allocation2 + $0x98] sm:$0xff] %vm469_vm0, %v440_v36  ;;  %v442_v38 = vld [vmem:[%s3049_s1 + $0xa8] sm:$0xff]  ;;  %v443_v39 = vld [vmem:[%s3049_s1 + $0xb0] sm:$0xff] }
  0x55   : > { %490 = vst.msk [vmem:[#allocation2 + $0xa0] sm:$0xff] %vm469_vm0, %v441_v37  ;;  %v444_v40 = vld [vmem:[%s3049_s1 + $0xb8] sm:$0xff]  ;;  %491 = vst.msk [vmem:[#allocation2 + $0xa8] sm:$0xff] %vm469_vm0, %v442_v38  ;;  %v445_v41 = vld [vmem:[%s3049_s1 + $0xc0] sm:$0xff] }
  0x56   : > { %492 = vst.msk [vmem:[#allocation2 + $0xb0] sm:$0xff] %vm469_vm0, %v443_v39  ;;  %493 = vst.msk [vmem:[#allocation2 + $0xb8] sm:$0xff] %vm469_vm0, %v444_v40  ;;  %v446_v42 = vld [vmem:[%s3049_s1 + $0xc8] sm:$0xff]  ;;  %v447_v43 = vld [vmem:[%s3049_s1 + $0xd0] sm:$0xff] }
  0x57   : > { %494 = vst.msk [vmem:[#allocation2 + $0xc0] sm:$0xff] %vm469_vm0, %v445_v41  ;;  %495 = vst.msk [vmem:[#allocation2 + $0xc8] sm:$0xff] %vm469_vm0, %v446_v42  ;;  %v448_v44 = vld [vmem:[%s3049_s1 + $0xd8] sm:$0xff]  ;;  %v449_v45 = vld [vmem:[%s3049_s1 + $0xe0] sm:$0xff] }
  0x58   : > { %496 = vst.msk [vmem:[#allocation2 + $0xd0] sm:$0xff] %vm469_vm0, %v447_v43  ;;  %v450_v46 = vld [vmem:[%s3049_s1 + $0xe8] sm:$0xff]  ;;  %497 = vst.msk [vmem:[#allocation2 + $0xd8] sm:$0xff] %vm469_vm0, %v448_v44  ;;  %v451_v47 = vld [vmem:[%s3049_s1 + $0xf0] sm:$0xff] }
  0x59   : > { %498 = vst.msk [vmem:[#allocation2 + $0xe0] sm:$0xff] %vm469_vm0, %v449_v45  ;;  %499 = vst.msk [vmem:[#allocation2 + $0xe8] sm:$0xff] %vm469_vm0, %v450_v46  ;;  %v452_v48 = vld [vmem:[%s3049_s1 + $0xf8] sm:$0xff]  ;;  %v453_v49 = vld [vmem:[%s3049_s1 + $0x100] sm:$0xff] }
  0x5a   : > { %500 = vst.msk [vmem:[#allocation2 + $0xf0] sm:$0xff] %vm469_vm0, %v451_v47  ;;  %501 = vst.msk [vmem:[#allocation2 + $0xf8] sm:$0xff] %vm469_vm0, %v452_v48  ;;  %v454_v50 = vld [vmem:[%s3049_s1 + $0x108] sm:$0xff]  ;;  %v455_v51 = vld [vmem:[%s3049_s1 + $0x110] sm:$0xff] }
  0x5b   : > { %502 = vst.msk [vmem:[#allocation2 + $0x100] sm:$0xff] %vm469_vm0, %v453_v49  ;;  %v456_v52 = vld [vmem:[%s3049_s1 + $0x118] sm:$0xff]  ;;  %503 = vst.msk [vmem:[#allocation2 + $0x108] sm:$0xff] %vm469_vm0, %v454_v50  ;;  %v457_v53 = vld [vmem:[%s3049_s1 + $0x120] sm:$0xff] }
  0x5c   : > { %504 = vst.msk [vmem:[#allocation2 + $0x110] sm:$0xff] %vm469_vm0, %v455_v51  ;;  %505 = vst.msk [vmem:[#allocation2 + $0x118] sm:$0xff] %vm469_vm0, %v456_v52  ;;  %v458_v54 = vld [vmem:[%s3049_s1 + $0x128] sm:$0xff]  ;;  %v459_v55 = vld [vmem:[%s3049_s1 + $0x130] sm:$0xff] }
  0x5d   : > { %506 = vst.msk [vmem:[#allocation2 + $0x120] sm:$0xff] %vm469_vm0, %v457_v53  ;;  %507 = vst.msk [vmem:[#allocation2 + $0x128] sm:$0xff] %vm469_vm0, %v458_v54  ;;  %v460_v56 = vld [vmem:[%s3049_s1 + $0x138] sm:$0xff]  ;;  %v461_v57 = vld [vmem:[%s3049_s1 + $0x140] sm:$0xff] }
  0x5e   : > { %508 = vst.msk [vmem:[#allocation2 + $0x130] sm:$0xff] %vm469_vm0, %v459_v55  ;;  %v462_v58 = vld [vmem:[%s3049_s1 + $0x148] sm:$0xff]  ;;  %509 = vst.msk [vmem:[#allocation2 + $0x138] sm:$0xff] %vm469_vm0, %v460_v56  ;;  %v463_v59 = vld [vmem:[%s3049_s1 + $0x150] sm:$0xff] }
  0x5f   : > { %510 = vst.msk [vmem:[#allocation2 + $0x140] sm:$0xff] %vm469_vm0, %v461_v57  ;;  %511 = vst.msk [vmem:[#allocation2 + $0x148] sm:$0xff] %vm469_vm0, %v462_v58  ;;  %v464_v60 = vld [vmem:[%s3049_s1 + $0x158] sm:$0xff]  ;;  %v465_v61 = vld [vmem:[%s3049_s1 + $0x160] sm:$0xff] }
  0x60   : > { %512 = vst.msk [vmem:[#allocation2 + $0x150] sm:$0xff] %vm469_vm0, %v463_v59  ;;  %513 = vst.msk [vmem:[#allocation2 + $0x158] sm:$0xff] %vm469_vm0, %v464_v60  ;;  %v466_v62 = vld [vmem:[%s3049_s1 + $0x168] sm:$0xff]  ;;  %v467_v63 = vld [vmem:[%s3049_s1 + $0x170] sm:$0xff] }
  0x61   : > { %514 = vst.msk [vmem:[#allocation2 + $0x160] sm:$0xff] %vm469_vm0, %v465_v61  ;;  %v468_v0 = vld [vmem:[%s3049_s1 + $0x178] sm:$0xff]  ;;  %515 = vst.msk [vmem:[#allocation2 + $0x168] sm:$0xff] %vm469_vm0, %v466_v62 }
  0x62   : > { %516 = vst.msk [vmem:[#allocation2 + $0x170] sm:$0xff] %vm469_vm0, %v467_v63  ;;  %517 = vst.msk [vmem:[#allocation2 + $0x178] sm:$0xff] %vm469_vm0, %v468_v0 }
  0x63 PF: > { %p518_p9 = pnand %p416_p5, %p412_p2 }
  0x64   : > { %s2517_s4 = scalar_lea.vmem (!%p518_p9), %s3049_s1, %s2299_s15  ;;  %s2604_s21 = scalar_lea.vmem (!%p518_p9), %s3053_s5, %s2299_s15 }
  0x65   : > { %521 = sbr.rel (%p518_p9) target bundleno = 321 (0x141), region = 89 }
  0x6a   : > { %v540_v1 = vlaneseq  ;;  %v2520_v3 = vld [vmem:[%s2517_s4 + $0x10] sm:$0xff]  ;;  %v2523_v5 = vld [vmem:[%s2517_s4] sm:$0xff]  ;;  %v2526_v6 = vld [vmem:[%s2517_s4 + $0x18] sm:$0xff]  ;;  %vm561_vm1 = vcmask 261120  }
  0x6b   : > { %v2529_v7 = vld [vmem:[%s2517_s4 + $0x8] sm:$0xff]  ;;  %v2540_v14 = vld [vmem:[%s2517_s4 + $0x20] sm:$0xff]  ;;  %v2549_v22 = vld [vmem:[%s2517_s4 + $0x38] sm:$0xff] }
  0x6c   : > { %v541_v2 = vshrl.u32 %v540_v1, 7  ;;  %v2537_v13 = vld [vmem:[%s2517_s4 + $0x28] sm:$0xff]  ;;  %v2552_v23 = vld [vmem:[%s2517_s4 + $0x30] sm:$0xff]  ;;  %v2562_v29 = vld [vmem:[%s2517_s4 + $0x40] sm:$0xff] }
  0x6d   : > { %v2559_v28 = vld [vmem:[%s2517_s4 + $0x48] sm:$0xff]  ;;  %v2569_v34 = vld [vmem:[%s2517_s4 + $0x58] sm:$0xff]  ;;  %v2572_v35 = vld [vmem:[%s2517_s4 + $0x50] sm:$0xff] }
  0x6e   : > { %v542_v4 = vsub.s32 0, %v541_v2  ;;  %v2579_v40 = vld [vmem:[%s2517_s4 + $0x68] sm:$0xff]  ;;  %v2582_v41 = vld [vmem:[%s2517_s4 + $0x60] sm:$0xff]  ;;  %v2589_v46 = vld [vmem:[%s2517_s4 + $0x78] sm:$0xff] }
  0x6f   : > { %v2592_v47 = vld [vmem:[%s2517_s4 + $0x70] sm:$0xff] }
  0x70   : > { %v543_v8 = vrot.slane %v2279_v16, %v542_v4 }
  0x72   : > { %v547_v9 = vmul.f32 %v543_v8, %v2520_v3  ;;  %v545_v10 = vmul.f32 %v543_v8, %v2523_v5  ;;  %v548_v11 = vmul.f32 %v543_v8, %v2526_v6  ;;  %v546_v12 = vmul.f32 %v543_v8, %v2529_v7 }
  0x73   : > { %v550_v20 = vmul.f32 %v543_v8, %v2537_v13  ;;  %v549_v21 = vmul.f32 %v543_v8, %v2540_v14  ;;  %v552_v26 = vmul.f32 %v543_v8, %v2549_v22  ;;  %v551_v27 = vmul.f32 %v543_v8, %v2552_v23 }
  0x74   : > { %v568_v15 = vsel %vm561_vm1, %v547_v9, 0.0  ;;  %v562_v17 = vsel %vm561_vm1, %v545_v10, 0.0  ;;  %v571_v18 = vsel %vm561_vm1, %v548_v11, 0.0  ;;  %v565_v19 = vsel %vm561_vm1, %v546_v12, 0.0 }
  0x75   : > { %569 = vadd.xlane.f32.xlu1 %v568_v15  ;;  %563 = vadd.xlane.f32.xlu0 %v562_v17  ;;  %v577_v24 = vsel %vm561_vm1, %v550_v20, 0.0  ;;  %v574_v25 = vsel %vm561_vm1, %v549_v21, 0.0  ;;  %v583_v30 = vsel %vm561_vm1, %v552_v26, 0.0  ;;  %v580_v31 = vsel %vm561_vm1, %v551_v27, 0.0 }
  0x76   : > { %v554_v32 = vmul.f32 %v543_v8, %v2559_v28  ;;  %v553_v33 = vmul.f32 %v543_v8, %v2562_v29  ;;  %v556_v38 = vmul.f32 %v543_v8, %v2569_v34  ;;  %v555_v39 = vmul.f32 %v543_v8, %v2572_v35 }
  0x77   : > { %v558_v44 = vmul.f32 %v543_v8, %v2579_v40  ;;  %v557_v45 = vmul.f32 %v543_v8, %v2582_v41  ;;  %v560_v50 = vmul.f32 %v543_v8, %v2589_v46  ;;  %v559_v51 = vmul.f32 %v543_v8, %v2592_v47 }
  0x78   : > { %v589_v36 = vsel %vm561_vm1, %v554_v32, 0.0  ;;  %v586_v37 = vsel %vm561_vm1, %v553_v33, 0.0  ;;  %v595_v42 = vsel %vm561_vm1, %v556_v38, 0.0  ;;  %v592_v43 = vsel %vm561_vm1, %v555_v39, 0.0 }
  0x79   : > { %572 = vadd.xlane.f32.xlu1 %v571_v18  ;;  %566 = vadd.xlane.f32.xlu0 %v565_v19  ;;  %v601_v48 = vsel %vm561_vm1, %v558_v44, 0.0  ;;  %v598_v49 = vsel %vm561_vm1, %v557_v45, 0.0  ;;  %v607_v52 = vsel %vm561_vm1, %v560_v50, 0.0  ;;  %v604_v53 = vsel %vm561_vm1, %v559_v51, 0.0 }
  0x7d   : > { %578 = vadd.xlane.f32.xlu1 %v577_v24  ;;  %575 = vadd.xlane.f32.xlu0 %v574_v25 }
  0x81   : > { %584 = vadd.xlane.f32.xlu1 %v583_v30  ;;  %581 = vadd.xlane.f32.xlu0 %v580_v31 }
  0x85   : > { %590 = vadd.xlane.f32.xlu1 %v589_v36  ;;  %587 = vadd.xlane.f32.xlu0 %v586_v37 }
  0x89   : > { %596 = vadd.xlane.f32.xlu1 %v595_v42  ;;  %593 = vadd.xlane.f32.xlu0 %v592_v43 }
  0x8d   : > { %602 = vadd.xlane.f32.xlu1 %v601_v48  ;;  %599 = vadd.xlane.f32.xlu0 %v598_v49 }
  0x91   : > { %608 = vadd.xlane.f32.xlu1 %v607_v52  ;;  %605 = vadd.xlane.f32.xlu0 %v604_v53 }
  0xfe   : > { %v570_v54 = vpop.xlane.xlu1 %569  ;;  %v564_v55 = vpop.xlane.xlu0 %563 }
  0xff   : > { %v1752_v56 = vmul.f32 -1.442695, %v570_v54  ;;  %v1750_v57 = vmul.f32 -1.442695, %v564_v55 }
 0x101   : > { %1935 = vpow2.f32 %v1752_v56 }
 0x102   : > { %1937 = vpow2.f32 %v1750_v57  ;;  %v573_v58 = vpop.xlane.xlu1 %572  ;;  %v567_v59 = vpop.xlane.xlu0 %566 }
 0x103   : > { %v1753_v60 = vmul.f32 -1.442695, %v573_v58  ;;  %v1751_v61 = vmul.f32 -1.442695, %v567_v59 }
 0x105   : > { %1939 = vpow2.f32 %v1753_v60 }
 0x106   : > { %1941 = vpow2.f32 %v1751_v61  ;;  %v579_v62 = vpop.xlane.xlu1 %578  ;;  %v576_v63 = vpop.xlane.xlu0 %575 }
 0x107   : > { %v1755_v0 = vmul.f32 -1.442695, %v579_v62  ;;  %v1754_v1 = vmul.f32 -1.442695, %v576_v63 }
 0x109   : > { %1943 = vpow2.f32 %v1755_v0 }
 0x10a   : > { %1945 = vpow2.f32 %v1754_v1  ;;  %v585_v2 = vpop.xlane.xlu1 %584  ;;  %v582_v4 = vpop.xlane.xlu0 %581 }
 0x10b   : > { %v1757_v8 = vmul.f32 -1.442695, %v585_v2  ;;  %v1756_v9 = vmul.f32 -1.442695, %v582_v4 }
 0x10d   : > { %1947 = vpow2.f32 %v1757_v8 }
 0x10e   : > { %v1936_v10 = vpop.eup %1935  ;;  %1949 = vpow2.f32 %v1756_v9  ;;  %v591_v11 = vpop.xlane.xlu1 %590 }
 0x10f   : > { %v588_v12 = vpop.xlane.xlu0 %587  ;;  %v1938_v15 = vpop.eup %1937  ;;  %v660_v17 = vadd.f32 1.0, %v1936_v10  ;;  %v1759_v18 = vmul.f32 -1.442695, %v591_v11 }
 0x110   : > { %v658_v19 = vadd.f32 1.0, %v1938_v15  ;;  %v1758_v20 = vmul.f32 -1.442695, %v588_v12 }
 0x111   : > { %1951 = vrcp.f32 %v660_v17 }
 0x112   : > { %v1940_v21 = vpop.eup %1939  ;;  %1953 = vrcp.f32 %v658_v19  ;;  %v597_v24 = vpop.xlane.xlu1 %596 }
 0x113   : > { %v594_v25 = vpop.xlane.xlu0 %593  ;;  %v1942_v26 = vpop.eup %1941  ;;  %v661_v27 = vadd.f32 1.0, %v1940_v21  ;;  %1955 = vpow2.f32 %v1759_v18  ;;  %v1761_v30 = vmul.f32 -1.442695, %v597_v24 }
 0x114   : > { %v659_v31 = vadd.f32 1.0, %v1942_v26  ;;  %1957 = vpow2.f32 %v1758_v20  ;;  %v1760_v32 = vmul.f32 -1.442695, %v594_v25 }
 0x115   : > { %1959 = vrcp.f32 %v661_v27 }
 0x116   : > { %v1944_v33 = vpop.eup %1943  ;;  %1961 = vrcp.f32 %v659_v31  ;;  %v603_v36 = vpop.xlane.xlu1 %602 }
 0x117   : > { %v600_v37 = vpop.xlane.xlu0 %599  ;;  %v1946_v38 = vpop.eup %1945  ;;  %v663_v39 = vadd.f32 1.0, %v1944_v33  ;;  %1963 = vpow2.f32 %v1761_v30  ;;  %v1763_v42 = vmul.f32 -1.442695, %v603_v36 }
 0x118   : > { %v662_v43 = vadd.f32 1.0, %v1946_v38  ;;  %1965 = vpow2.f32 %v1760_v32  ;;  %v1762_v44 = vmul.f32 -1.442695, %v600_v37 }
 0x119   : > { %1967 = vrcp.f32 %v663_v39 }
 0x11a   : > { %v1948_v45 = vpop.eup %1947  ;;  %1969 = vrcp.f32 %v662_v43  ;;  %v609_v48 = vpop.xlane.xlu1 %608 }
 0x11b   : > { %v606_v49 = vpop.xlane.xlu0 %605  ;;  %v1950_v50 = vpop.eup %1949  ;;  %v665_v51 = vadd.f32 1.0, %v1948_v45  ;;  %1971 = vpow2.f32 %v1763_v42  ;;  %v1765_v52 = vmul.f32 -1.442695, %v609_v48 }
 0x11c   : > { %v664_v53 = vadd.f32 1.0, %v1950_v50  ;;  %1973 = vpow2.f32 %v1762_v44  ;;  %v1764_v54 = vmul.f32 -1.442695, %v606_v49 }
 0x11d   : > { %1975 = vrcp.f32 %v665_v51 }
 0x11e   : > { %v1952_v55 = vpop.eup %1951  ;;  %1977 = vrcp.f32 %v664_v53 }
 0x11f   : > { %v1954_v56 = vpop.eup %1953  ;;  %v708_v57 = vmul.f32 %v1952_v55, %v2520_v3  ;;  %1979 = vpow2.f32 %v1765_v52 }
 0x120   : > { %v1956_v58 = vpop.eup %1955  ;;  %v706_v59 = vmul.f32 %v1954_v56, %v2523_v5  ;;  %1981 = vpow2.f32 %v1764_v54 }
 0x121   : > { %v1958_v60 = vpop.eup %1957  ;;  %725 = vst.msk [vmem:[%s2604_s21 + $0x10] sm:$0xff] %vm561_vm1, %v708_v57  ;;  %v667_v61 = vadd.f32 1.0, %v1956_v58 }
 0x122   : > { %v1960_v62 = vpop.eup %1959  ;;  %723 = vst.msk [vmem:[%s2604_s21] sm:$0xff] %vm561_vm1, %v706_v59  ;;  %v666_v63 = vadd.f32 1.0, %v1958_v60 }
 0x123   : > { %v1962_v0 = vpop.eup %1961  ;;  %v709_v1 = vmul.f32 %v1960_v62, %v2526_v6  ;;  %1983 = vrcp.f32 %v667_v61 }
 0x124   : > { %v1964_v3 = vpop.eup %1963  ;;  %v707_v2 = vmul.f32 %v1962_v0, %v2529_v7  ;;  %1985 = vrcp.f32 %v666_v63 }
 0x125   : > { %v1966_v5 = vpop.eup %1965  ;;  %726 = vst.msk [vmem:[%s2604_s21 + $0x18] sm:$0xff] %vm561_vm1, %v709_v1  ;;  %v669_v4 = vadd.f32 1.0, %v1964_v3 }
 0x126   : > { %v1968_v8 = vpop.eup %1967  ;;  %724 = vst.msk [vmem:[%s2604_s21 + $0x8] sm:$0xff] %vm561_vm1, %v707_v2  ;;  %v668_v9 = vadd.f32 1.0, %v1966_v5 }
 0x127   : > { %v1970_v10 = vpop.eup %1969  ;;  %v711_v11 = vmul.f32 %v1968_v8, %v2537_v13  ;;  %1987 = vrcp.f32 %v669_v4 }
 0x128   : > { %v1972_v6 = vpop.eup %1971  ;;  %v710_v12 = vmul.f32 %v1970_v10, %v2540_v14  ;;  %1989 = vrcp.f32 %v668_v9 }
 0x129   : > { %v1974_v7 = vpop.eup %1973  ;;  %728 = vst.msk [vmem:[%s2604_s21 + $0x28] sm:$0xff] %vm561_vm1, %v711_v11  ;;  %v671_v15 = vadd.f32 1.0, %v1972_v6 }
 0x12a   : > { %v1976_v17 = vpop.eup %1975  ;;  %727 = vst.msk [vmem:[%s2604_s21 + $0x20] sm:$0xff] %vm561_vm1, %v710_v12  ;;  %v670_v18 = vadd.f32 1.0, %v1974_v7 }
 0x12b   : > { %v1978_v19 = vpop.eup %1977  ;;  %v713_v20 = vmul.f32 %v1976_v17, %v2549_v22  ;;  %1991 = vrcp.f32 %v671_v15 }
 0x12c   : > { %v1980_v13 = vpop.eup %1979  ;;  %v712_v21 = vmul.f32 %v1978_v19, %v2552_v23  ;;  %1993 = vrcp.f32 %v670_v18 }
 0x12d   : > { %v1982_v14 = vpop.eup %1981  ;;  %730 = vst.msk [vmem:[%s2604_s21 + $0x38] sm:$0xff] %vm561_vm1, %v713_v20  ;;  %v673_v24 = vadd.f32 1.0, %v1980_v13 }
 0x12e   : > { %729 = vst.msk [vmem:[%s2604_s21 + $0x30] sm:$0xff] %vm561_vm1, %v712_v21  ;;  %v672_v25 = vadd.f32 1.0, %v1982_v14 }
 0x12f   : > { %1995 = vrcp.f32 %v673_v24 }
 0x130   : > { %v1984_v26 = vpop.eup %1983  ;;  %1997 = vrcp.f32 %v672_v25 }
 0x131   : > { %v1986_v22 = vpop.eup %1985  ;;  %v715_v27 = vmul.f32 %v1984_v26, %v2559_v28 }
 0x132   : > { %v714_v23 = vmul.f32 %v1986_v22, %v2562_v29 }
 0x133   : > { %732 = vst.msk [vmem:[%s2604_s21 + $0x48] sm:$0xff] %vm561_vm1, %v715_v27 }
 0x134   : > { %v1988_v30 = vpop.eup %1987  ;;  %731 = vst.msk [vmem:[%s2604_s21 + $0x40] sm:$0xff] %vm561_vm1, %v714_v23 }
 0x135   : > { %v1990_v31 = vpop.eup %1989  ;;  %v717_v32 = vmul.f32 %v1988_v30, %v2569_v34 }
 0x136   : > { %v716_v33 = vmul.f32 %v1990_v31, %v2572_v35 }
 0x137   : > { %734 = vst.msk [vmem:[%s2604_s21 + $0x58] sm:$0xff] %vm561_vm1, %v717_v32 }
 0x138   : > { %v1992_v36 = vpop.eup %1991  ;;  %733 = vst.msk [vmem:[%s2604_s21 + $0x50] sm:$0xff] %vm561_vm1, %v716_v33 }
 0x139   : > { %v1994_v28 = vpop.eup %1993  ;;  %v719_v29 = vmul.f32 %v1992_v36, %v2579_v40 }
 0x13a   : > { %v718_v37 = vmul.f32 %v1994_v28, %v2582_v41 }
 0x13b   : > { %736 = vst.msk [vmem:[%s2604_s21 + $0x68] sm:$0xff] %vm561_vm1, %v719_v29 }
 0x13c   : > { %v1996_v38 = vpop.eup %1995  ;;  %735 = vst.msk [vmem:[%s2604_s21 + $0x60] sm:$0xff] %vm561_vm1, %v718_v37 }
 0x13d   : > { %v1998_v39 = vpop.eup %1997  ;;  %v721_v34 = vmul.f32 %v1996_v38, %v2589_v46 }
 0x13e   : > { %v720_v35 = vmul.f32 %v1998_v39, %v2592_v47 }
 0x13f   : > { %738 = vst.msk [vmem:[%s2604_s21 + $0x78] sm:$0xff] %vm561_vm1, %v721_v34 }
 0x140   : > { %737 = vst.msk [vmem:[%s2604_s21 + $0x70] sm:$0xff] %vm561_vm1, %v720_v35 }
 0x141 PF: > { %p1766_p10 = scmp.ne.s32.totalorder %s2121_s20, 0 }
 0x143   : > { %741 = sbr.rel (%p1766_p10) target bundleno = 337 (0x151), region = 93 }
 0x148   : > { %vm742_vm2 = vcmask 261120   ;;  %v2147_v40 = vmov 0.0  }
 0x149   : > { %743 = vst.msk [vmem:[#allocation3] sm:$0xff] %vm742_vm2, %v2147_v40  ;;  %744 = vst.msk [vmem:[#allocation3 + $0x8] sm:$0xff] %vm742_vm2, %v2147_v40 }
 0x14a   : > { %745 = vst.msk [vmem:[#allocation3 + $0x10] sm:$0xff] %vm742_vm2, %v2147_v40  ;;  %746 = vst.msk [vmem:[#allocation3 + $0x18] sm:$0xff] %vm742_vm2, %v2147_v40 }
 0x14b   : > { %747 = vst.msk [vmem:[#allocation3 + $0x20] sm:$0xff] %vm742_vm2, %v2147_v40  ;;  %748 = vst.msk [vmem:[#allocation3 + $0x28] sm:$0xff] %vm742_vm2, %v2147_v40 }
 0x14c   : > { %749 = vst.msk [vmem:[#allocation3 + $0x30] sm:$0xff] %vm742_vm2, %v2147_v40  ;;  %750 = vst.msk [vmem:[#allocation3 + $0x38] sm:$0xff] %vm742_vm2, %v2147_v40 }
 0x14d   : > { %751 = vst.msk [vmem:[#allocation3 + $0x40] sm:$0xff] %vm742_vm2, %v2147_v40  ;;  %752 = vst.msk [vmem:[#allocation3 + $0x48] sm:$0xff] %vm742_vm2, %v2147_v40 }
 0x14e   : > { %753 = vst.msk [vmem:[#allocation3 + $0x50] sm:$0xff] %vm742_vm2, %v2147_v40  ;;  %754 = vst.msk [vmem:[#allocation3 + $0x58] sm:$0xff] %vm742_vm2, %v2147_v40 }
 0x14f   : > { %755 = vst.msk [vmem:[#allocation3 + $0x60] sm:$0xff] %vm742_vm2, %v2147_v40  ;;  %756 = vst.msk [vmem:[#allocation3 + $0x68] sm:$0xff] %vm742_vm2, %v2147_v40 }
 0x150   : > { %757 = vst.msk [vmem:[#allocation3 + $0x70] sm:$0xff] %vm742_vm2, %v2147_v40  ;;  %758 = vst.msk [vmem:[#allocation3 + $0x78] sm:$0xff] %vm742_vm2, %v2147_v40 }
 0x151 PF: > { %v775_v41 = vld [vmem:[%s2296_s29 + $0x70] sm:$0xff]  ;;  %v773_v46 = vld [vmem:[%s2296_s29 + $0x60] sm:$0xff]  ;;  %v2148_v47 = vmov 0   ;;  %v776_v42 = vld [vmem:[%s2296_s29 + $0x78] sm:$0xff]  ;;  %s1767_s8 = sshll.u32 %s2121_s20, 7  ;;  %vm1091_vm3 = vcmask 261120  }
 0x152   : > { %2000 = vset.pattern.permute.xlu1 %v2148_v47  ;;  %1999 = vset.pattern.permute.xlu0 %v2148_v47  ;;  %v774_v43 = vld [vmem:[%s2296_s29 + $0x68] sm:$0xff]  ;;  %v772_v44 = vld [vmem:[%s2296_s29 + $0x58] sm:$0xff]  ;;  %v771_v45 = vld [vmem:[%s2296_s29 + $0x50] sm:$0xff]  ;;  %s760_s10 = sadd.s32 %s1767_s8, %s395_s0  ;;  %p1776_p11 = scmp.ne.s32.totalorder %s2121_s20, 2 }
 0x153   : > { %866 = vperm.xlu0 %1999, %v775_v41   ;;  %856 = vperm.xlu1 %2000, %v773_v46   ;;  %v770_v48 = vld [vmem:[%s2296_s29 + $0x48] sm:$0xff]  ;;  %v769_v49 = vld [vmem:[%s2296_s29 + $0x40] sm:$0xff]  ;;  %v768_v50 = vld [vmem:[%s2296_s29 + $0x38] sm:$0xff]  ;;  %s2692_s7 = scalar_lea.vmem [#allocation2], %s760_s10  ;;  %s1128_s20 = sadd.s32 (!%p1776_p11), %s2299_s15, %s395_s0 }
 0x154   : > { %v767_v51 = vld [vmem:[%s2296_s29 + $0x30] sm:$0xff]  ;;  %v766_v52 = vld [vmem:[%s2296_s29 + $0x28] sm:$0xff]  ;;  %v765_v53 = vld [vmem:[%s2296_s29 + $0x20] sm:$0xff] }
 0x155   : > { %v764_v54 = vld [vmem:[%s2296_s29 + $0x18] sm:$0xff]  ;;  %v763_v55 = vld [vmem:[%s2296_s29 + $0x10] sm:$0xff]  ;;  %v762_v56 = vld [vmem:[%s2296_s29 + $0x8] sm:$0xff] }
 0x156   : > { %v761_v57 = vld [vmem:[%s2296_s29] sm:$0xff]  ;;  %v792_v62 = vld [vmem:[%s2692_s7 + $0x70] sm:$0xff]  ;;  %v793_v0 = vld [vmem:[%s2692_s7 + $0x78] sm:$0xff]  ;;  %s1129_s29 = scalar_lea.vmem (!%p1776_p11), [#allocation2], %s1128_s20 }
 0x157   : > { %871 = vperm.xlu0 %1999, %v776_v42   ;;  %861 = vperm.xlu1 %2000, %v774_v43   ;;  %v2001_v58 = vld [vmem:[%s2315_s30] sm:$0xff]   ;;  %v791_v1 = vld [vmem:[%s2692_s7 + $0x68] sm:$0xff]  ;;  %v789_v10 = vld [vmem:[%s2692_s7 + $0x58] sm:$0xff] }
 0x158   : > { %v2002_v59 = vld [vmem:[%s2315_s30 + $0x20] sm:$0xff]   ;;  %1827 = vmatprep.mubr.bf16.mxu0 %v2001_v58  ;;  %v788_v11 = vld [vmem:[%s2692_s7 + $0x50] sm:$0xff]  ;;  %v787_v19 = vld [vmem:[%s2692_s7 + $0x48] sm:$0xff] }
 0x159   : > { %1835 = vmatprep.mubr.bf16.mxu1 %v2002_v59  ;;  %v790_v63 = vld [vmem:[%s2692_s7 + $0x60] sm:$0xff]  ;;  %v785_v26 = vld [vmem:[%s2692_s7 + $0x38] sm:$0xff]  ;;  %v784_v22 = vld [vmem:[%s2692_s7 + $0x30] sm:$0xff] }
 0x15a   : > { %v786_v20 = vld [vmem:[%s2692_s7 + $0x40] sm:$0xff]  ;;  %v783_v33 = vld [vmem:[%s2692_s7 + $0x28] sm:$0xff]  ;;  %v781_v34 = vld [vmem:[%s2692_s7 + $0x18] sm:$0xff] }
 0x15b   : > { %851 = vperm.xlu1 %2000, %v772_v44   ;;  %846 = vperm.xlu0 %1999, %v771_v45   ;;  %v782_v36 = vld [vmem:[%s2692_s7 + $0x20] sm:$0xff]  ;;  %v780_v35 = vld [vmem:[%s2692_s7 + $0x10] sm:$0xff]  ;;  %v779_v43 = vld [vmem:[%s2692_s7 + $0x8] sm:$0xff] }
 0x15c   : > { %v778_v44 = vld [vmem:[%s2692_s7] sm:$0xff]  ;;  %v2008_v58 = vld [vmem:[%s2315_s30 + $0x38] sm:$0xff]   ;;  %v892_v59 = vld [vmem:[#allocation3 + $0x10] sm:$0xff] }
 0x15f   : > { %841 = vperm.xlu1 %2000, %v770_v48   ;;  %836 = vperm.xlu0 %1999, %v769_v49  }
 0x163   : > { %831 = vperm.xlu1 %2000, %v768_v50   ;;  %826 = vperm.xlu0 %1999, %v767_v51  }
 0x167   : > { %821 = vperm.xlu1 %2000, %v766_v52   ;;  %816 = vperm.xlu0 %1999, %v765_v53   ;;  %v2003_v53 = vld [vmem:[%s2315_s30 + $0x8] sm:$0xff]  }
 0x16b   : > { %811 = vperm.xlu1 %2000, %v764_v54   ;;  %806 = vperm.xlu0 %1999, %v763_v55   ;;  %v2004_v54 = vld [vmem:[%s2315_s30 + $0x28] sm:$0xff]   ;;  %v2005_v55 = vld [vmem:[%s2315_s30 + $0x10] sm:$0xff]  }
 0x16f   : > { %801 = vperm.xlu1 %2000, %v762_v56   ;;  %796 = vperm.xlu0 %1999, %v761_v57   ;;  %v2006_v56 = vld [vmem:[%s2315_s30 + $0x30] sm:$0xff]   ;;  %v2007_v57 = vld [vmem:[%s2315_s30 + $0x18] sm:$0xff]  }
 0x1ce   : > { %v867_v60 = vpop.permute.xlu0 %866  ;;  %v857_v61 = vpop.permute.xlu1 %856 }
 0x1cf   : > { %v888_v5 = vmul.f32 %v867_v60, %v792_v62  ;;  %v886_v4 = vmul.f32 %v857_v61, %v790_v63  ;;  %v900_v60 = vld [vmem:[#allocation3 + $0x50] sm:$0xff]  ;;  %v890_v63 = vld [vmem:[#allocation3] sm:$0xff] }
 0x1d2   : > { %v872_v3 = vpop.permute.xlu0 %871  ;;  %v862_v2 = vpop.permute.xlu1 %861 }
 0x1d3   : > { %v889_v8 = vmul.f32 %v872_v3, %v793_v0  ;;  %v887_v9 = vmul.f32 %v862_v2, %v791_v1  ;;  %v898_v0 = vld [vmem:[#allocation3 + $0x40] sm:$0xff] }
 0x1d5   : > { %v929_v6 = vpack.c.bf16 %v889_v8, %v888_v5  ;;  %v928_v15 = vpack.c.bf16 %v887_v9, %v886_v4  ;;  %v893_v4 = vld [vmem:[#allocation3 + $0x18] sm:$0xff] }
 0x1d6   : > { %v852_v12 = vpop.permute.xlu1 %851  ;;  %v847_v7 = vpop.permute.xlu0 %846  ;;  %v901_v8 = vld [vmem:[#allocation3 + $0x58] sm:$0xff] }
 0x1d7   : > { %v885_v17 = vmul.f32 %v852_v12, %v789_v10  ;;  %v884_v18 = vmul.f32 %v847_v7, %v788_v11  ;;  %1811 = vmatprep.subr.bf16.mxu0 %v929_v6  ;;  %1843 = vmatprep.subr.bf16.mxu1 %v929_v6  ;;  %v891_v12 = vld [vmem:[#allocation3 + $0x8] sm:$0xff] }
 0x1d8   : > { %1812 = vmatpush3.bf16.msra.mxu0 %v929_v6  ;;  %1851 = vmatpush3.bf16.msra.mxu1 %v929_v6  ;;  %v899_v7 = vld [vmem:[#allocation3 + $0x48] sm:$0xff] }
 0x1d9   : > { %1813 = vmatprep.subr.bf16.mxu0 %v928_v15  ;;  %1844 = vmatprep.subr.bf16.mxu1 %v928_v15  ;;  %v927_v14 = vpack.c.bf16 %v885_v17, %v884_v18 }
 0x1da   : > { %v842_v13 = vpop.permute.xlu1 %841  ;;  %v837_v21 = vpop.permute.xlu0 %836 }
 0x1db   : > { %v883_v24 = vmul.f32 %v842_v13, %v787_v19  ;;  %v882_v25 = vmul.f32 %v837_v21, %v786_v20  ;;  %v896_v20 = vld [vmem:[#allocation3 + $0x30] sm:$0xff] }
 0x1dc   : > { %1814 = vmatpush3.bf16.msra.mxu0 %v928_v15  ;;  %1852 = vmatpush3.bf16.msra.mxu1 %v928_v15  ;;  %v904_v13 = vld [vmem:[#allocation3 + $0x70] sm:$0xff] }
 0x1dd   : > { %1815 = vmatprep.subr.bf16.mxu0 %v927_v14  ;;  %1845 = vmatprep.subr.bf16.mxu1 %v927_v14  ;;  %v926_v30 = vpack.c.bf16 %v883_v24, %v882_v25 }
 0x1de   : > { %v832_v27 = vpop.permute.xlu1 %831  ;;  %v827_v23 = vpop.permute.xlu0 %826 }
 0x1df   : > { %v881_v31 = vmul.f32 %v832_v27, %v785_v26  ;;  %v880_v32 = vmul.f32 %v827_v23, %v784_v22  ;;  %v894_v26 = vld [vmem:[#allocation3 + $0x20] sm:$0xff] }
 0x1e0   : > { %1816 = vmatpush3.bf16.msra.mxu0 %v927_v14  ;;  %1853 = vmatpush3.bf16.msra.mxu1 %v927_v14  ;;  %v902_v22 = vld [vmem:[#allocation3 + $0x60] sm:$0xff] }
 0x1e1   : > { %1817 = vmatprep.subr.bf16.mxu0 %v926_v30  ;;  %1846 = vmatprep.subr.bf16.mxu1 %v926_v30  ;;  %v925_v37 = vpack.c.bf16 %v881_v31, %v880_v32  ;;  %v897_v32 = vld [vmem:[#allocation3 + $0x38] sm:$0xff] }
 0x1e2   : > { %v822_v28 = vpop.permute.xlu1 %821  ;;  %v817_v29 = vpop.permute.xlu0 %816 }
 0x1e3   : > { %v879_v38 = vmul.f32 %v822_v28, %v783_v33  ;;  %v878_v39 = vmul.f32 %v817_v29, %v782_v36  ;;  %v905_v33 = vld [vmem:[#allocation3 + $0x78] sm:$0xff] }
 0x1e4   : > { %1818 = vmatpush3.bf16.msra.mxu0 %v926_v30  ;;  %1854 = vmatpush3.bf16.msra.mxu1 %v926_v30 }
 0x1e5   : > { %1819 = vmatprep.subr.bf16.mxu0 %v925_v37  ;;  %1847 = vmatprep.subr.bf16.mxu1 %v925_v37  ;;  %v924_v46 = vpack.c.bf16 %v879_v38, %v878_v39  ;;  %v895_v38 = vld [vmem:[#allocation3 + $0x28] sm:$0xff] }
 0x1e6   : > { %v812_v40 = vpop.permute.xlu1 %811  ;;  %v807_v41 = vpop.permute.xlu0 %806  ;;  %v903_v39 = vld [vmem:[#allocation3 + $0x68] sm:$0xff] }
 0x1e7   : > { %v877_v47 = vmul.f32 %v812_v40, %v781_v34  ;;  %v876_v42 = vmul.f32 %v807_v41, %v780_v35 }
 0x1e8   : > { %1820 = vmatpush3.bf16.msra.mxu0 %v925_v37  ;;  %1855 = vmatpush3.bf16.msra.mxu1 %v925_v37 }
 0x1e9   : > { %1821 = vmatprep.subr.bf16.mxu0 %v924_v46  ;;  %1848 = vmatprep.subr.bf16.mxu1 %v924_v46  ;;  %v923_v49 = vpack.c.bf16 %v877_v47, %v876_v42 }
 0x1ea   : > { %v802_v45 = vpop.permute.xlu1 %801  ;;  %v797_v48 = vpop.permute.xlu0 %796 }
 0x1eb   : > { %v875_v50 = vmul.f32 %v802_v45, %v779_v43  ;;  %v874_v51 = vmul.f32 %v797_v48, %v778_v44 }
 0x1ec   : > { %1822 = vmatpush3.bf16.msra.mxu0 %v924_v46  ;;  %1856 = vmatpush3.bf16.msra.mxu1 %v924_v46 }
 0x1ed   : > { %1823 = vmatprep.subr.bf16.mxu0 %v923_v49  ;;  %1849 = vmatprep.subr.bf16.mxu1 %v923_v49  ;;  %v922_v52 = vpack.c.bf16 %v875_v50, %v874_v51 }
 0x1f0   : > { %1824 = vmatpush3.bf16.msra.mxu0 %v923_v49  ;;  %1857 = vmatpush3.bf16.msra.mxu1 %v923_v49 }
 0x1f1   : > { %1825 = vmatprep.subr.bf16.mxu0 %v922_v52  ;;  %1850 = vmatprep.subr.bf16.mxu1 %v922_v52 }
 0x1f4   : > { %1826 = vmatpush3.bf16.msra.mxu0 %v922_v52  ;;  %1858 = vmatpush3.bf16.msra.mxu1 %v922_v52 }
 0x1f7   : > { %1828 = vmatmul.mubr.bf16.vlgmr.msra.gmra.mxu0 %v2003_v53  ;;  %1836 = vmatmul.mubr.bf16.vlgmr.msra.gmra.mxu1 %v2004_v54 }
 0x1f8   : > { %1831 = vmatprep.mubr.bf16.mxu0 %v2005_v55  ;;  %1839 = vmatprep.mubr.bf16.mxu1 %v2006_v56 }
 0x1ff   : > { %1832 = vmatmul.mubr.bf16.gmra.mxu0 %v2007_v57  ;;  %1840 = vmatmul.mubr.bf16.gmra.mxu1 %v2008_v58 }
 0x2b7   : > { %v1829_v61 = vpop.f32.mrf.mxu0  ;;  %v1837_v62 = vpop.f32.mrf.mxu1 }
 0x2b8   : > { %v1077_v1 = vadd.f32 %v1829_v61, %v892_v59  ;;  %v1085_v3 = vadd.f32 %v1837_v62, %v900_v60 }
 0x2b9   : > { %v1012_v2 = vpop.f32.mrf.mxu0  ;;  %v1044_v5 = vpop.f32.mrf.mxu1 }
 0x2ba   : > { %1094 = vst.msk [vmem:[#allocation3 + $0x10] sm:$0xff] %vm1091_vm3, %v1077_v1  ;;  %1102 = vst.msk [vmem:[#allocation3 + $0x50] sm:$0xff] %vm1091_vm3, %v1085_v3  ;;  %v1075_v9 = vadd.f32 %v1012_v2, %v890_v63  ;;  %v1083_v10 = vadd.f32 %v1044_v5, %v898_v0 }
 0x2bb   : > { %v1830_v11 = vpop.f32.mrf.mxu0  ;;  %v1838_v6 = vpop.f32.mrf.mxu1 }
 0x2bc   : > { %1092 = vst.msk [vmem:[#allocation3] sm:$0xff] %vm1091_vm3, %v1075_v9  ;;  %1100 = vst.msk [vmem:[#allocation3 + $0x40] sm:$0xff] %vm1091_vm3, %v1083_v10  ;;  %v1078_v15 = vadd.f32 %v1830_v11, %v893_v4  ;;  %v1086_v17 = vadd.f32 %v1838_v6, %v901_v8 }
 0x2bd   : > { %v1015_v18 = vpop.f32.mrf.mxu0  ;;  %v1047_v19 = vpop.f32.mrf.mxu1 }
 0x2be   : > { %1095 = vst.msk [vmem:[#allocation3 + $0x18] sm:$0xff] %vm1091_vm3, %v1078_v15  ;;  %1103 = vst.msk [vmem:[#allocation3 + $0x58] sm:$0xff] %vm1091_vm3, %v1086_v17  ;;  %v1076_v21 = vadd.f32 %v1015_v18, %v891_v12  ;;  %v1084_v14 = vadd.f32 %v1047_v19, %v899_v7 }
 0x2bf   : > { %v1833_v24 = vpop.f32.mrf.mxu0  ;;  %v1841_v25 = vpop.f32.mrf.mxu1 }
 0x2c0   : > { %1093 = vst.msk [vmem:[#allocation3 + $0x8] sm:$0xff] %vm1091_vm3, %v1076_v21  ;;  %1101 = vst.msk [vmem:[#allocation3 + $0x48] sm:$0xff] %vm1091_vm3, %v1084_v14  ;;  %v1081_v27 = vadd.f32 %v1833_v24, %v896_v20  ;;  %v1089_v23 = vadd.f32 %v1841_v25, %v904_v13 }
 0x2c1   : > { %v1028_v30 = vpop.f32.mrf.mxu0  ;;  %v1060_v31 = vpop.f32.mrf.mxu1 }
 0x2c2   : > { %1098 = vst.msk [vmem:[#allocation3 + $0x30] sm:$0xff] %vm1091_vm3, %v1081_v27  ;;  %1106 = vst.msk [vmem:[#allocation3 + $0x70] sm:$0xff] %vm1091_vm3, %v1089_v23  ;;  %v1079_v36 = vadd.f32 %v1028_v30, %v894_v26  ;;  %v1087_v28 = vadd.f32 %v1060_v31, %v902_v22 }
 0x2c3   : > { %v1834_v29 = vpop.f32.mrf.mxu0  ;;  %v1842_v37 = vpop.f32.mrf.mxu1 }
 0x2c4   : > { %1096 = vst.msk [vmem:[#allocation3 + $0x20] sm:$0xff] %vm1091_vm3, %v1079_v36  ;;  %1104 = vst.msk [vmem:[#allocation3 + $0x60] sm:$0xff] %vm1091_vm3, %v1087_v28  ;;  %v1082_v34 = vadd.f32 %v1834_v29, %v897_v32  ;;  %v1090_v35 = vadd.f32 %v1842_v37, %v905_v33  ;;  %1111 = sbr.rel (%p1776_p11) target bundleno = 1086 (0x43e), region = 97 }
 0x2c5   : > { %v1031_v40 = vpop.f32.mrf.mxu0  ;;  %v1063_v41 = vpop.f32.mrf.mxu1 }
 0x2c6   : > { %1099 = vst.msk [vmem:[#allocation3 + $0x38] sm:$0xff] %vm1091_vm3, %v1082_v34  ;;  %1107 = vst.msk [vmem:[#allocation3 + $0x78] sm:$0xff] %vm1091_vm3, %v1090_v35  ;;  %v1080_v46 = vadd.f32 %v1031_v40, %v895_v38  ;;  %v1088_v47 = vadd.f32 %v1063_v41, %v903_v39 }
 0x2c8   : > { %1097 = vst.msk [vmem:[#allocation3 + $0x28] sm:$0xff] %vm1091_vm3, %v1080_v46  ;;  %1105 = vst.msk [vmem:[#allocation3 + $0x68] sm:$0xff] %vm1091_vm3, %v1088_v47 }
 0x2c9   : > { %v1114_v42 = vld [vmem:[%s2289_s18 + $0x10] sm:$0xff]  ;;  %v1112_v43 = vld [vmem:[%s2289_s18] sm:$0xff]  ;;  %v2149_v44 = vmov 0   ;;  %v1115_v45 = vld [vmem:[%s2289_s18 + $0x18] sm:$0xff]  ;;  %v1405_v27 = vlaneseq }
 0x2ca   : > { %2010 = vset.pattern.permute.xlu1 %v2149_v44  ;;  %2009 = vset.pattern.permute.xlu0 %v2149_v44  ;;  %v1113_v48 = vld [vmem:[%s2289_s18 + $0x8] sm:$0xff]  ;;  %v1116_v50 = vld [vmem:[%s2289_s18 + $0x20] sm:$0xff]  ;;  %v1119_v51 = vld [vmem:[%s2289_s18 + $0x38] sm:$0xff]  ;;  %v1258_v61 = vmul.f32 %v1112_v43, %v1112_v43  ;;  %v1260_v63 = vmul.f32 %v1114_v42, %v1114_v42  ;;  %v1261_v0 = vmul.f32 %v1115_v45, %v1115_v45 }
 0x2cb   : > { %1174 = vperm.xlu1 %2010, %v1114_v42   ;;  %1164 = vperm.xlu0 %2009, %v1112_v43   ;;  %v1117_v49 = vld [vmem:[%s2289_s18 + $0x28] sm:$0xff]  ;;  %v1118_v52 = vld [vmem:[%s2289_s18 + $0x30] sm:$0xff]  ;;  %v1120_v54 = vld [vmem:[%s2289_s18 + $0x40] sm:$0xff]  ;;  %v1259_v62 = vmul.f32 %v1113_v48, %v1113_v48  ;;  %v1262_v3 = vmul.f32 %v1116_v50, %v1116_v50  ;;  %v1265_v2 = vmul.f32 %v1119_v51, %v1119_v51  ;;  %v1406_v31 = vshrl.u32 %v1405_v27, 7 }
 0x2cc   : > { %v1121_v53 = vld [vmem:[%s2289_s18 + $0x48] sm:$0xff]  ;;  %v1123_v55 = vld [vmem:[%s2289_s18 + $0x58] sm:$0xff]  ;;  %v1122_v56 = vld [vmem:[%s2289_s18 + $0x50] sm:$0xff]  ;;  %v1263_v1 = vmul.f32 %v1117_v49, %v1117_v49  ;;  %v1264_v5 = vmul.f32 %v1118_v52, %v1118_v52  ;;  %v1266_v8 = vmul.f32 %v1120_v54, %v1120_v54 }
 0x2cd   : > { %v1125_v57 = vld [vmem:[%s2289_s18 + $0x68] sm:$0xff]  ;;  %v1124_v58 = vld [vmem:[%s2289_s18 + $0x60] sm:$0xff]  ;;  %v1127_v59 = vld [vmem:[%s2289_s18 + $0x78] sm:$0xff]  ;;  %v1267_v4 = vmul.f32 %v1121_v53, %v1121_v53  ;;  %v1269_v9 = vmul.f32 %v1123_v55, %v1123_v55  ;;  %v1268_v10 = vmul.f32 %v1122_v56, %v1122_v56  ;;  %v1407_v36 = vsub.s32 0, %v1406_v31 }
 0x2ce   : > { %v1126_v60 = vld [vmem:[%s2289_s18 + $0x70] sm:$0xff]  ;;  %v1271_v11 = vmul.f32 %v1125_v57, %v1125_v57  ;;  %v1270_v6 = vmul.f32 %v1124_v58, %v1124_v58  ;;  %v1273_v12 = vmul.f32 %v1127_v59, %v1127_v59  ;;  %v1146_v28 = vld [vmem:[#allocation3] sm:$0xff]  ;;  %v1147_v29 = vld [vmem:[#allocation3 + $0x8] sm:$0xff]  ;;  %s2779_s18 = sadd.s32 %s2299_s15, %s409_s17  ;;  %s2955_s17 = scalar_lea.vmem %s3053_s5, %s2299_s15 }
 0x2cf   : > { %1179 = vperm.xlu1 %2010, %v1115_v45   ;;  %1169 = vperm.xlu0 %2009, %v1113_v48   ;;  %v1272_v7 = vmul.f32 %v1126_v60, %v1126_v60  ;;  %v1131_v37 = vld [vmem:[%s1129_s29 + $0x8] sm:$0xff]  ;;  %v1130_v38 = vld [vmem:[%s1129_s29] sm:$0xff]  ;;  %v1148_v39 = vld [vmem:[#allocation3 + $0x10] sm:$0xff]  ;;  %v2782_v42 = vrot.slane %v2279_v16, %v1407_v36  ;;  %s2809_s13 = scalar_lea.vmem [#allocation2], %s2779_s18 }
 0x2d0   : > { %v1149_v34 = vld [vmem:[#allocation3 + $0x18] sm:$0xff]  ;;  %v1132_v46 = vld [vmem:[%s1129_s29 + $0x10] sm:$0xff]  ;;  %v1135_v47 = vld [vmem:[%s1129_s29 + $0x28] sm:$0xff] }
 0x2d1   : > { %v1133_v41 = vld [vmem:[%s1129_s29 + $0x18] sm:$0xff]  ;;  %v1134_v43 = vld [vmem:[%s1129_s29 + $0x20] sm:$0xff]  ;;  %v1136_v45 = vld [vmem:[%s1129_s29 + $0x30] sm:$0xff] }
 0x2d2   : > { %v1137_v44 = vld [vmem:[%s1129_s29 + $0x38] sm:$0xff]  ;;  %v2784_v48 = vld [vmem:[%s1129_s29 + $0x48] sm:$0xff]  ;;  %v2794_v16 = vld [vmem:[%s1129_s29 + $0x60] sm:$0xff] }
 0x2d3   : > { %1189 = vperm.xlu1 %2010, %v1117_v49   ;;  %1184 = vperm.xlu0 %2009, %v1116_v50   ;;  %v2786_v49 = vld [vmem:[%s1129_s29 + $0x40] sm:$0xff] }
 0x2d7   : > { %1199 = vperm.xlu1 %2010, %v1119_v51   ;;  %1194 = vperm.xlu0 %2009, %v1118_v52  }
 0x2db   : > { %1209 = vperm.xlu1 %2010, %v1121_v53   ;;  %1204 = vperm.xlu0 %2009, %v1120_v54   ;;  %v2788_v54 = vld [vmem:[%s1129_s29 + $0x58] sm:$0xff] }
 0x2df   : > { %1219 = vperm.xlu1 %2010, %v1123_v55   ;;  %1214 = vperm.xlu0 %2009, %v1122_v56   ;;  %v2790_v55 = vld [vmem:[%s1129_s29 + $0x50] sm:$0xff]  ;;  %v2792_v56 = vld [vmem:[%s1129_s29 + $0x68] sm:$0xff] }
 0x2e3   : > { %1229 = vperm.xlu1 %2010, %v1125_v57   ;;  %1224 = vperm.xlu0 %2009, %v1124_v58   ;;  %v2796_v57 = vld [vmem:[%s1129_s29 + $0x78] sm:$0xff]  ;;  %v2798_v58 = vld [vmem:[%s1129_s29 + $0x70] sm:$0xff] }
 0x2e7   : > { %1239 = vperm.xlu1 %2010, %v1127_v59   ;;  %1234 = vperm.xlu0 %2009, %v1126_v60  }
 0x2eb   : > { %1281 = vperm.xlu1 %2010, %v1259_v62   ;;  %1276 = vperm.xlu0 %2009, %v1258_v61  }
 0x2ef   : > { %1291 = vperm.xlu1 %2010, %v1261_v0   ;;  %1286 = vperm.xlu0 %2009, %v1260_v63  }
 0x2f3   : > { %1301 = vperm.xlu1 %2010, %v1263_v1   ;;  %1296 = vperm.xlu0 %2009, %v1262_v3   ;;  %v1151_v1 = vld [vmem:[#allocation3 + $0x28] sm:$0xff] }
 0x2f7   : > { %1311 = vperm.xlu1 %2010, %v1265_v2   ;;  %1306 = vperm.xlu0 %2009, %v1264_v5  }
 0x2fb   : > { %1321 = vperm.xlu1 %2010, %v1267_v4   ;;  %1316 = vperm.xlu0 %2009, %v1266_v8   ;;  %v1150_v8 = vld [vmem:[#allocation3 + $0x20] sm:$0xff] }
 0x2ff   : > { %1331 = vperm.xlu1 %2010, %v1269_v9   ;;  %1326 = vperm.xlu0 %2009, %v1268_v10  }
 0x303   : > { %1341 = vperm.xlu1 %2010, %v1271_v11   ;;  %1336 = vperm.xlu0 %2009, %v1270_v6  }
 0x307   : > { %1351 = vperm.xlu1 %2010, %v1273_v12   ;;  %1346 = vperm.xlu0 %2009, %v1272_v7  }
 0x346   : > { %v1175_v15 = vpop.permute.xlu1 %1174  ;;  %v1165_v17 = vpop.permute.xlu0 %1164 }
 0x347   : > { %v1242_v50 = vmul.f32 %v1165_v17, %v1146_v28  ;;  %v1244_v61 = vmul.f32 %v1175_v15, %v1148_v39 }
 0x34a   : > { %v1180_v18 = vpop.permute.xlu1 %1179  ;;  %v1170_v19 = vpop.permute.xlu0 %1169 }
 0x34b   : > { %v1243_v51 = vmul.f32 %v1170_v19, %v1147_v29  ;;  %v1245_v62 = vmul.f32 %v1180_v18, %v1149_v34  ;;  %v1153_v18 = vld [vmem:[#allocation3 + $0x38] sm:$0xff] }
 0x34e   : > { %v2749_v20 = vpop.permute.xlu1 %1189  ;;  %v2751_v13 = vpop.permute.xlu0 %1184 }
 0x34f   : > { %v1247_v12 = vmul.f32 %v2749_v20, %v1151_v1  ;;  %v1246_v17 = vmul.f32 %v2751_v13, %v1150_v8  ;;  %v1152_v20 = vld [vmem:[#allocation3 + $0x30] sm:$0xff] }
 0x352   : > { %v2753_v21 = vpop.permute.xlu1 %1199  ;;  %v2755_v14 = vpop.permute.xlu0 %1194 }
 0x353   : > { %v1248_v34 = vmul.f32 %v2755_v14, %v1152_v20  ;;  %v1161_v20 = vld [vmem:[#allocation3 + $0x78] sm:$0xff] }
 0x356   : > { %v2757_v24 = vpop.permute.xlu1 %1209  ;;  %v2759_v25 = vpop.permute.xlu0 %1204 }
 0x35a   : > { %v2761_v26 = vpop.permute.xlu1 %1219  ;;  %v2763_v22 = vpop.permute.xlu0 %1214 }
 0x35e   : > { %v2765_v23 = vpop.permute.xlu1 %1229  ;;  %v2767_v30 = vpop.permute.xlu0 %1224 }
 0x362   : > { %v2772_v32 = vpop.permute.xlu1 %1239  ;;  %v2774_v33 = vpop.permute.xlu0 %1234 }
 0x366   : > { %v1282_v35 = vpop.permute.xlu1 %1281  ;;  %v1277_v40 = vpop.permute.xlu0 %1276 }
 0x367   : > { %v1355_v52 = vmul.f32 %v1282_v35, %v1131_v37  ;;  %v1354_v53 = vmul.f32 %v1277_v40, %v1130_v38  ;;  %v1249_v37 = vmul.f32 %v2753_v21, %v1153_v18  ;;  %v1155_v35 = vld [vmem:[#allocation3 + $0x48] sm:$0xff] }
 0x369   : > { %v2800_v59 = vadd.f32 %v1355_v52, %v1243_v51  ;;  %v2802_v60 = vadd.f32 %v1354_v53, %v1242_v50  ;;  %v1251_v50 = vmul.f32 %v2757_v24, %v1155_v35  ;;  %v1156_v24 = vld [vmem:[#allocation3 + $0x50] sm:$0xff] }
 0x36a   : > { %v1292_v63 = vpop.permute.xlu1 %1291  ;;  %v1287_v0 = vpop.permute.xlu0 %1286  ;;  %v1252_v8 = vmul.f32 %v2763_v22, %v1156_v24 }
 0x36b   : > { %v1357_v3 = vmul.f32 %v1292_v63, %v1133_v41  ;;  %v1356_v2 = vmul.f32 %v1287_v0, %v1132_v46  ;;  %v1411_v5 = vmul.f32 %v2782_v42, %v2800_v59  ;;  %v1410_v4 = vmul.f32 %v2782_v42, %v2802_v60  ;;  %1388 = vst.msk [vmem:[%s2809_s13] sm:$0xff] %vm1091_vm3, %v2802_v60 }
 0x36c   : > { %1389 = vst.msk [vmem:[%s2809_s13 + $0x8] sm:$0xff] %vm1091_vm3, %v2800_v59 }
 0x36d   : > { %v2817_v9 = vadd.f32 %v1357_v3, %v1245_v62  ;;  %v2819_v10 = vadd.f32 %v1356_v2, %v1244_v61  ;;  %v1429_v11 = vsel %vm1091_vm3, %v1411_v5, 0.0  ;;  %v1426_v6 = vsel %vm1091_vm3, %v1410_v4, 0.0  ;;  %v1157_v61 = vld [vmem:[#allocation3 + $0x58] sm:$0xff] }
 0x36e   : > { %v1302_v7 = vpop.permute.xlu1 %1301  ;;  %1430 = vadd.xlane.f32.xlu1 %v1429_v11  ;;  %1427 = vadd.xlane.f32.xlu0 %v1426_v6  ;;  %v1297_v15 = vpop.permute.xlu0 %1296  ;;  %v1253_v2 = vmul.f32 %v2761_v26, %v1157_v61  ;;  %v1159_v11 = vld [vmem:[#allocation3 + $0x68] sm:$0xff]  ;;  %v1158_v26 = vld [vmem:[#allocation3 + $0x60] sm:$0xff] }
 0x36f   : > { %v1359_v19 = vmul.f32 %v1302_v7, %v1135_v47  ;;  %v1358_v27 = vmul.f32 %v1297_v15, %v1134_v43  ;;  %v1412_v31 = vmul.f32 %v2782_v42, %v2819_v10  ;;  %1390 = vst.msk [vmem:[%s2809_s13 + $0x10] sm:$0xff] %vm1091_vm3, %v2819_v10  ;;  %1391 = vst.msk [vmem:[%s2809_s13 + $0x18] sm:$0xff] %vm1091_vm3, %v2817_v9  ;;  %v1154_v47 = vld [vmem:[#allocation3 + $0x40] sm:$0xff] }
 0x370   : > { %v1413_v36 = vmul.f32 %v2782_v42, %v2817_v9  ;;  %v1250_v53 = vmul.f32 %v2759_v25, %v1154_v47  ;;  %v1255_v18 = vmul.f32 %v2765_v23, %v1159_v11  ;;  %v1160_v23 = vld [vmem:[#allocation3 + $0x70] sm:$0xff] }
 0x371   : > { %v2835_v28 = vadd.f32 %v1359_v19, %v1247_v12  ;;  %v2837_v13 = vadd.f32 %v1358_v27, %v1246_v17  ;;  %v1432_v29 = vsel %vm1091_vm3, %v1412_v31, 0.0  ;;  %v1254_v31 = vmul.f32 %v2767_v30, %v1158_v26 }
 0x372   : > { %v1312_v38 = vpop.permute.xlu1 %1311  ;;  %1433 = vadd.xlane.f32.xlu0 %v1432_v29  ;;  %v1307_v39 = vpop.permute.xlu0 %1306  ;;  %v1435_v21 = vsel %vm1091_vm3, %v1413_v36, 0.0 }
 0x373   : > { %v1361_v40 = vmul.f32 %v1312_v38, %v1137_v44  ;;  %v1360_v41 = vmul.f32 %v1307_v39, %v1136_v45  ;;  %v1414_v46 = vmul.f32 %v2782_v42, %v2837_v13  ;;  %1392 = vst.msk [vmem:[%s2809_s13 + $0x20] sm:$0xff] %vm1091_vm3, %v2837_v13  ;;  %1393 = vst.msk [vmem:[%s2809_s13 + $0x28] sm:$0xff] %vm1091_vm3, %v2835_v28 }
 0x374   : > { %v1415_v45 = vmul.f32 %v2782_v42, %v2835_v28 }
 0x375   : > { %v2851_v43 = vadd.f32 %v1361_v40, %v1249_v37  ;;  %v2853_v14 = vadd.f32 %v1360_v41, %v1248_v34  ;;  %v1438_v44 = vsel %vm1091_vm3, %v1414_v46, 0.0  ;;  %v1257_v34 = vmul.f32 %v2772_v32, %v1161_v20 }
 0x376   : > { %v1322_v51 = vpop.permute.xlu1 %1321  ;;  %1436 = vadd.xlane.f32.xlu0 %v1435_v21  ;;  %1439 = vadd.xlane.f32.xlu1 %v1438_v44  ;;  %v1317_v52 = vpop.permute.xlu0 %1316  ;;  %v1256_v41 = vmul.f32 %v2774_v33, %v1160_v23 }
 0x377   : > { %v1363_v62 = vmul.f32 %v1322_v51, %v2784_v48  ;;  %v1362_v63 = vmul.f32 %v1317_v52, %v2786_v49  ;;  %v1416_v0 = vmul.f32 %v2782_v42, %v2853_v14  ;;  %1394 = vst.msk [vmem:[%s2809_s13 + $0x30] sm:$0xff] %vm1091_vm3, %v2853_v14  ;;  %1395 = vst.msk [vmem:[%s2809_s13 + $0x38] sm:$0xff] %vm1091_vm3, %v2851_v43  ;;  %v1441_v49 = vsel %vm1091_vm3, %v1415_v45, 0.0 }
 0x378   : > { %v1417_v1 = vmul.f32 %v2782_v42, %v2851_v43 }
 0x379   : > { %v2872_v25 = vadd.f32 %v1363_v62, %v1251_v50  ;;  %v2874_v48 = vadd.f32 %v1362_v63, %v1250_v53  ;;  %v1444_v3 = vsel %vm1091_vm3, %v1416_v0, 0.0 }
 0x37a   : > { %v1332_v5 = vpop.permute.xlu1 %1331  ;;  %1442 = vadd.xlane.f32.xlu0 %v1441_v49  ;;  %1445 = vadd.xlane.f32.xlu1 %v1444_v3  ;;  %v1327_v4 = vpop.permute.xlu0 %1326  ;;  %v1447_v15 = vsel %vm1091_vm3, %v1417_v1, 0.0 }
 0x37b   : > { %v1365_v6 = vmul.f32 %v1332_v5, %v2788_v54  ;;  %v1364_v12 = vmul.f32 %v1327_v4, %v2790_v55  ;;  %v1418_v7 = vmul.f32 %v2782_v42, %v2874_v48  ;;  %1396 = vst.msk [vmem:[%s2809_s13 + $0x40] sm:$0xff] %vm1091_vm3, %v2874_v48  ;;  %1397 = vst.msk [vmem:[%s2809_s13 + $0x48] sm:$0xff] %vm1091_vm3, %v2872_v25 }
 0x37c   : > { %v1419_v55 = vmul.f32 %v2782_v42, %v2872_v25 }
 0x37d   : > { %v2891_v22 = vadd.f32 %v1365_v6, %v1253_v2  ;;  %v2893_v17 = vadd.f32 %v1364_v12, %v1252_v8  ;;  %v1450_v54 = vsel %vm1091_vm3, %v1418_v7, 0.0 }
 0x37e   : > { %v1342_v19 = vpop.permute.xlu1 %1341  ;;  %1448 = vadd.xlane.f32.xlu0 %v1447_v15  ;;  %1451 = vadd.xlane.f32.xlu1 %v1450_v54  ;;  %v1337_v27 = vpop.permute.xlu0 %1336 }
 0x37f   : > { %v1367_v36 = vmul.f32 %v1342_v19, %v2792_v56  ;;  %v1366_v29 = vmul.f32 %v1337_v27, %v2794_v16  ;;  %v1420_v37 = vmul.f32 %v2782_v42, %v2893_v17  ;;  %1398 = vst.msk [vmem:[%s2809_s13 + $0x50] sm:$0xff] %vm1091_vm3, %v2893_v17  ;;  %1399 = vst.msk [vmem:[%s2809_s13 + $0x58] sm:$0xff] %vm1091_vm3, %v2891_v22  ;;  %v1453_v16 = vsel %vm1091_vm3, %v1419_v55, 0.0 }
 0x380   : > { %v1421_v30 = vmul.f32 %v2782_v42, %v2891_v22 }
 0x381   : > { %v2912_v38 = vadd.f32 %v1367_v36, %v1255_v18  ;;  %v2914_v56 = vadd.f32 %v1366_v29, %v1254_v31  ;;  %v1456_v39 = vsel %vm1091_vm3, %v1420_v37, 0.0 }
 0x382   : > { %v1352_v35 = vpop.permute.xlu1 %1351  ;;  %1454 = vadd.xlane.f32.xlu0 %v1453_v16  ;;  %1457 = vadd.xlane.f32.xlu1 %v1456_v39  ;;  %v1347_v40 = vpop.permute.xlu0 %1346  ;;  %v1459_v21 = vsel %vm1091_vm3, %v1421_v30, 0.0 }
 0x383   : > { %v1369_v46 = vmul.f32 %v1352_v35, %v2796_v57  ;;  %1400 = vst.msk [vmem:[%s2809_s13 + $0x60] sm:$0xff] %vm1091_vm3, %v2914_v56  ;;  %1401 = vst.msk [vmem:[%s2809_s13 + $0x68] sm:$0xff] %vm1091_vm3, %v2912_v38  ;;  %v1368_v47 = vmul.f32 %v1347_v40, %v2798_v58  ;;  %v1422_v32 = vmul.f32 %v2782_v42, %v2914_v56 }
 0x384   : > { %v1423_v57 = vmul.f32 %v2782_v42, %v2912_v38 }
 0x385   : > { %v2931_v44 = vadd.f32 %v1369_v46, %v1257_v34  ;;  %v2933_v45 = vadd.f32 %v1368_v47, %v1256_v41  ;;  %v1462_v33 = vsel %vm1091_vm3, %v1422_v32, 0.0 }
 0x386   : > { %1460 = vadd.xlane.f32.xlu0 %v1459_v21  ;;  %1463 = vadd.xlane.f32.xlu1 %v1462_v33  ;;  %v1465_v50 = vsel %vm1091_vm3, %v1423_v57, 0.0 }
 0x387   : > { %1403 = vst.msk [vmem:[%s2809_s13 + $0x78] sm:$0xff] %vm1091_vm3, %v2931_v44  ;;  %1402 = vst.msk [vmem:[%s2809_s13 + $0x70] sm:$0xff] %vm1091_vm3, %v2933_v45  ;;  %v1424_v58 = vmul.f32 %v2782_v42, %v2933_v45  ;;  %v1425_v52 = vmul.f32 %v2782_v42, %v2931_v44 }
 0x389   : > { %v1468_v51 = vsel %vm1091_vm3, %v1424_v58, 0.0  ;;  %v1471_v53 = vsel %vm1091_vm3, %v1425_v52, 0.0 }
 0x38a   : > { %1466 = vadd.xlane.f32.xlu0 %v1465_v50  ;;  %1469 = vadd.xlane.f32.xlu1 %v1468_v51  ;;  %v1572_v51 = vld [vmem:[%s2955_s17 + $0x8] sm:$0xff] }
 0x38e   : > { %1472 = vadd.xlane.f32.xlu0 %v1471_v53 }
 0x3f7   : > { %v1431_v61 = vpop.xlane.xlu1 %1430  ;;  %v1428_v62 = vpop.xlane.xlu0 %1427 }
 0x3f8   : > { %v1778_v63 = vmul.f32 -1.442695, %v1431_v61  ;;  %v1777_v0 = vmul.f32 -1.442695, %v1428_v62  ;;  %v1571_v62 = vld [vmem:[%s2955_s17] sm:$0xff] }
 0x3fa   : > { %2011 = vpow2.f32 %v1778_v63 }
 0x3fb   : > { %2013 = vpow2.f32 %v1777_v0  ;;  %v1434_v24 = vpop.xlane.xlu0 %1433 }
 0x3fc   : > { %v1779_v1 = vmul.f32 -1.442695, %v1434_v24 }
 0x3fe   : > { %2015 = vpow2.f32 %v1779_v1 }
 0x3ff   : > { %v1440_v49 = vpop.xlane.xlu1 %1439  ;;  %v1437_v3 = vpop.xlane.xlu0 %1436 }
 0x400   : > { %v1781_v2 = vmul.f32 -1.442695, %v1440_v49  ;;  %v1780_v5 = vmul.f32 -1.442695, %v1437_v3 }
 0x402   : > { %2017 = vpow2.f32 %v1781_v2 }
 0x403   : > { %2019 = vpow2.f32 %v1780_v5  ;;  %v1446_v42 = vpop.xlane.xlu1 %1445  ;;  %v1443_v4 = vpop.xlane.xlu0 %1442 }
 0x404   : > { %v1783_v8 = vmul.f32 -1.442695, %v1446_v42  ;;  %v1782_v11 = vmul.f32 -1.442695, %v1443_v4  ;;  %v1573_v42 = vld [vmem:[%s2955_s17 + $0x10] sm:$0xff] }
 0x406   : > { %2021 = vpow2.f32 %v1783_v8 }
 0x407   : > { %v2012_v6 = vpop.eup %2011  ;;  %2023 = vpow2.f32 %v1782_v11  ;;  %v1452_v12 = vpop.xlane.xlu1 %1451 }
 0x408   : > { %v1449_v7 = vpop.xlane.xlu0 %1448  ;;  %v2014_v26 = vpop.eup %2013  ;;  %v1523_v15 = vadd.f32 1.0, %v2012_v6  ;;  %v1785_v54 = vmul.f32 -1.442695, %v1452_v12 }
 0x409   : > { %v1522_v55 = vadd.f32 1.0, %v2014_v26  ;;  %v1784_v18 = vmul.f32 -1.442695, %v1449_v7  ;;  %v1575_v26 = vld [vmem:[%s2955_s17 + $0x20] sm:$0xff] }
 0x40a   : > { %2025 = vrcp.f32 %v1523_v15 }
 0x40b   : > { %v2016_v19 = vpop.eup %2015  ;;  %2027 = vrcp.f32 %v1522_v55  ;;  %v1458_v27 = vpop.xlane.xlu1 %1457 }
 0x40c   : > { %v1455_v31 = vpop.xlane.xlu0 %1454  ;;  %v1524_v20 = vadd.f32 1.0, %v2016_v19  ;;  %2029 = vpow2.f32 %v1785_v54  ;;  %v1787_v36 = vmul.f32 -1.442695, %v1458_v27 }
 0x40d   : > { %v1786_v29 = vmul.f32 -1.442695, %v1455_v31  ;;  %2031 = vpow2.f32 %v1784_v18 }
 0x40e   : > { %2033 = vrcp.f32 %v1524_v20 }
 0x40f   : > { %v2018_v37 = vpop.eup %2017  ;;  %2035 = vpow2.f32 %v1787_v36  ;;  %v1464_v23 = vpop.xlane.xlu1 %1463 }
 0x410   : > { %v1461_v30 = vpop.xlane.xlu0 %1460  ;;  %v2020_v16 = vpop.eup %2019  ;;  %v1526_v39 = vadd.f32 1.0, %v2018_v37  ;;  %2037 = vpow2.f32 %v1786_v29  ;;  %v1789_v34 = vmul.f32 -1.442695, %v1464_v23  ;;  %v1577_v29 = vld [vmem:[%s2955_s17 + $0x30] sm:$0xff] }
 0x411   : > { %v1525_v35 = vadd.f32 1.0, %v2020_v16  ;;  %v1788_v40 = vmul.f32 -1.442695, %v1461_v30 }
 0x412   : > { %2039 = vrcp.f32 %v1526_v39 }
 0x413   : > { %v2022_v41 = vpop.eup %2021  ;;  %2041 = vrcp.f32 %v1525_v35  ;;  %v1470_v46 = vpop.xlane.xlu1 %1469 }
 0x414   : > { %v1467_v47 = vpop.xlane.xlu0 %1466  ;;  %v2024_v32 = vpop.eup %2023  ;;  %v1528_v21 = vadd.f32 1.0, %v2022_v41  ;;  %2043 = vpow2.f32 %v1789_v34  ;;  %v1791_v33 = vmul.f32 -1.442695, %v1470_v46 }
 0x415   : > { %v1527_v57 = vadd.f32 1.0, %v2024_v32  ;;  %2045 = vpow2.f32 %v1788_v40  ;;  %v1790_v58 = vmul.f32 -1.442695, %v1467_v47  ;;  %v1579_v32 = vld [vmem:[%s2955_s17 + $0x40] sm:$0xff] }
 0x416   : > { %2047 = vrcp.f32 %v1528_v21 }
 0x417   : > { %v2026_v50 = vpop.eup %2025  ;;  %2049 = vrcp.f32 %v1527_v57 }
 0x418   : > { %v1473_v52 = vpop.xlane.xlu0 %1472  ;;  %v2028_v53 = vpop.eup %2027  ;;  %v1588_v61 = vmul.f32 %v2026_v50, %v2800_v59  ;;  %2051 = vpow2.f32 %v1791_v33  ;;  %v1578_v33 = vld [vmem:[%s2955_s17 + $0x38] sm:$0xff] }
 0x419   : > { %v1792_v63 = vmul.f32 -1.442695, %v1473_v52  ;;  %v2030_v0 = vpop.eup %2029  ;;  %v1587_v24 = vmul.f32 %v2028_v53, %v2802_v60  ;;  %2053 = vpow2.f32 %v1790_v58 }
 0x41a   : > { %v2032_v1 = vpop.eup %2031  ;;  %v1604_v49 = vadd.f32 %v1588_v61, %v1572_v51  ;;  %v1530_v3 = vadd.f32 1.0, %v2030_v0  ;;  %v1581_v51 = vld [vmem:[%s2955_s17 + $0x50] sm:$0xff] }
 0x41b   : > { %2055 = vpow2.f32 %v1792_v63  ;;  %v2034_v2 = vpop.eup %2033  ;;  %v1603_v5 = vadd.f32 %v1587_v24, %v1571_v62  ;;  %v1529_v4 = vadd.f32 1.0, %v2032_v1  ;;  %v1580_v62 = vld [vmem:[%s2955_s17 + $0x48] sm:$0xff]  ;;  %v1583_v24 = vld [vmem:[%s2955_s17 + $0x60] sm:$0xff] }
 0x41c   : > { %v2036_v59 = vpop.eup %2035  ;;  %1620 = vst.msk [vmem:[%s2955_s17 + $0x8] sm:$0xff] %vm1091_vm3, %v1604_v49  ;;  %v1589_v8 = vmul.f32 %v2034_v2, %v2819_v10  ;;  %2057 = vrcp.f32 %v1530_v3  ;;  %v1574_v10 = vld [vmem:[%s2955_s17 + $0x18] sm:$0xff] }
 0x41d   : > { %v2038_v11 = vpop.eup %2037  ;;  %1619 = vst.msk [vmem:[%s2955_s17] sm:$0xff] %vm1091_vm3, %v1603_v5  ;;  %2059 = vrcp.f32 %v1529_v4  ;;  %v1532_v60 = vadd.f32 1.0, %v2036_v59  ;;  %v1582_v49 = vld [vmem:[%s2955_s17 + $0x58] sm:$0xff] }
 0x41e   : > { %v1605_v6 = vadd.f32 %v1589_v8, %v1573_v42  ;;  %v1531_v12 = vadd.f32 1.0, %v2038_v11  ;;  %v1585_v42 = vld [vmem:[%s2955_s17 + $0x70] sm:$0xff]  ;;  %v1584_v8 = vld [vmem:[%s2955_s17 + $0x68] sm:$0xff] }
 0x41f   : > { %v2040_v7 = vpop.eup %2039  ;;  %2061 = vrcp.f32 %v1532_v60  ;;  %v1586_v60 = vld [vmem:[%s2955_s17 + $0x78] sm:$0xff] }
 0x420   : > { %v2042_v15 = vpop.eup %2041  ;;  %1621 = vst.msk [vmem:[%s2955_s17 + $0x10] sm:$0xff] %vm1091_vm3, %v1605_v6  ;;  %v1591_v54 = vmul.f32 %v2040_v7, %v2837_v13  ;;  %2063 = vrcp.f32 %v1531_v12  ;;  %v1576_v13 = vld [vmem:[%s2955_s17 + $0x28] sm:$0xff] }
 0x421   : > { %v2044_v55 = vpop.eup %2043  ;;  %v1590_v18 = vmul.f32 %v2042_v15, %v2817_v9 }
 0x422   : > { %v2046_v19 = vpop.eup %2045  ;;  %v1607_v27 = vadd.f32 %v1591_v54, %v1575_v26  ;;  %v1534_v31 = vadd.f32 1.0, %v2044_v55 }
 0x423   : > { %v2048_v20 = vpop.eup %2047  ;;  %v1606_v36 = vadd.f32 %v1590_v18, %v1574_v10  ;;  %v1533_v37 = vadd.f32 1.0, %v2046_v19 }
 0x424   : > { %v2050_v23 = vpop.eup %2049  ;;  %1623 = vst.msk [vmem:[%s2955_s17 + $0x20] sm:$0xff] %vm1091_vm3, %v1607_v27  ;;  %v1593_v30 = vmul.f32 %v2048_v20, %v2853_v14  ;;  %2065 = vrcp.f32 %v1534_v31 }
 0x425   : > { %v2052_v16 = vpop.eup %2051  ;;  %1622 = vst.msk [vmem:[%s2955_s17 + $0x18] sm:$0xff] %vm1091_vm3, %v1606_v36  ;;  %v1592_v9 = vmul.f32 %v2050_v23, %v2835_v28  ;;  %2067 = vrcp.f32 %v1533_v37 }
 0x426   : > { %v2054_v39 = vpop.eup %2053  ;;  %v1609_v34 = vadd.f32 %v1593_v30, %v1577_v29  ;;  %v1536_v35 = vadd.f32 1.0, %v2052_v16 }
 0x427   : > { %v1608_v41 = vadd.f32 %v1592_v9, %v1576_v13  ;;  %v1535_v46 = vadd.f32 1.0, %v2054_v39 }
 0x428   : > { %v2056_v40 = vpop.eup %2055  ;;  %1625 = vst.msk [vmem:[%s2955_s17 + $0x30] sm:$0xff] %vm1091_vm3, %v1609_v34  ;;  %2069 = vrcp.f32 %v1536_v35 }
 0x429   : > { %v1537_v14 = vadd.f32 1.0, %v2056_v40  ;;  %v2058_v47 = vpop.eup %2057  ;;  %1624 = vst.msk [vmem:[%s2955_s17 + $0x28] sm:$0xff] %vm1091_vm3, %v1608_v41  ;;  %2071 = vrcp.f32 %v1535_v46 }
 0x42a   : > { %v2060_v28 = vpop.eup %2059  ;;  %v1595_v21 = vmul.f32 %v2058_v47, %v2874_v48 }
 0x42b   : > { %2073 = vrcp.f32 %v1537_v14  ;;  %v1594_v57 = vmul.f32 %v2060_v28, %v2851_v43 }
 0x42c   : > { %v2062_v58 = vpop.eup %2061  ;;  %v1611_v50 = vadd.f32 %v1595_v21, %v1579_v32 }
 0x42d   : > { %v2064_v52 = vpop.eup %2063  ;;  %v1610_v53 = vadd.f32 %v1594_v57, %v1578_v33  ;;  %v1597_v61 = vmul.f32 %v2062_v58, %v2893_v17 }
 0x42e   : > { %1627 = vst.msk [vmem:[%s2955_s17 + $0x40] sm:$0xff] %vm1091_vm3, %v1611_v50  ;;  %v1596_v48 = vmul.f32 %v2064_v52, %v2872_v25 }
 0x42f   : > { %1626 = vst.msk [vmem:[%s2955_s17 + $0x38] sm:$0xff] %vm1091_vm3, %v1610_v53  ;;  %v1613_v63 = vadd.f32 %v1597_v61, %v1581_v51 }
 0x430   : > { %v1612_v43 = vadd.f32 %v1596_v48, %v1580_v62 }
 0x431   : > { %v2066_v0 = vpop.eup %2065  ;;  %1629 = vst.msk [vmem:[%s2955_s17 + $0x50] sm:$0xff] %vm1091_vm3, %v1613_v63 }
 0x432   : > { %v2068_v1 = vpop.eup %2067  ;;  %1628 = vst.msk [vmem:[%s2955_s17 + $0x48] sm:$0xff] %vm1091_vm3, %v1612_v43  ;;  %v1599_v17 = vmul.f32 %v2066_v0, %v2914_v56 }
 0x433   : > { %v1598_v25 = vmul.f32 %v2068_v1, %v2891_v22 }
 0x434   : > { %v1615_v3 = vadd.f32 %v1599_v17, %v1583_v24 }
 0x435   : > { %v2070_v2 = vpop.eup %2069  ;;  %v1614_v5 = vadd.f32 %v1598_v25, %v1582_v49 }
 0x436   : > { %v2072_v4 = vpop.eup %2071  ;;  %1631 = vst.msk [vmem:[%s2955_s17 + $0x60] sm:$0xff] %vm1091_vm3, %v1615_v3  ;;  %v1601_v59 = vmul.f32 %v2070_v2, %v2933_v45 }
 0x437   : > { %1630 = vst.msk [vmem:[%s2955_s17 + $0x58] sm:$0xff] %vm1091_vm3, %v1614_v5  ;;  %v1600_v56 = vmul.f32 %v2072_v4, %v2912_v38 }
 0x438   : > { %v2074_v11 = vpop.eup %2073  ;;  %v1617_v22 = vadd.f32 %v1601_v59, %v1585_v42 }
 0x439   : > { %v1602_v6 = vmul.f32 %v2074_v11, %v2931_v44  ;;  %v1616_v12 = vadd.f32 %v1600_v56, %v1584_v8 }
 0x43a   : > { %1633 = vst.msk [vmem:[%s2955_s17 + $0x70] sm:$0xff] %vm1091_vm3, %v1617_v22 }
 0x43b   : > { %v1618_v7 = vadd.f32 %v1602_v6, %v1586_v60  ;;  %1632 = vst.msk [vmem:[%s2955_s17 + $0x68] sm:$0xff] %vm1091_vm3, %v1616_v12 }
 0x43d   : > { %1634 = vst.msk [vmem:[%s2955_s17 + $0x78] sm:$0xff] %vm1091_vm3, %v1618_v7 }
 0x43e PF: > { %s15_s26 = sadd.s32 1, %s2145_s26   ;;  %s3059_s15 = sld [smem:[#allocation5_spill]] }
 0x43f   : > { %p12_p12 = scmp.ge.s32.totalorder %s15_s26, 20   ;;  %s3060_s18 = smov %s2117_s19 }
 0x440   : > { %s3061_s19 = smov %s2245_s9  ;;  %s3062_s20 = smov %s2133_s23 }
 0x441   : > { %s3063_s21 = smov %s2137_s24  ;;  %s3064_s22 = smov %s2141_s25 }
 0x442   : > { %s3065_s23 = smov %s3069_s27  ;;  %s3066_s24 = smov %s3073_s28 }
 0x443   :  { %14 = sbr.rel (!%p12_p12) target bundleno = 8 (0x8), region = 140 }
 0x444   : > { %s3067_s25 = smov %s3059_s15 }

</bundles_post_ra>
